<compile_context>
chip_gen: v7x
topology: tpu7x:2x2x1
jax: 0.10.0
libtpu: 0.0.40
codegen_flags: <defaults>
</compile_context>

<pallas_src>
import jax
import jax.numpy as jnp
from jax import lax
from jax.experimental import pallas as pl
from jax.experimental.pallas import tpu as pltpu


def _chip_defaults():
    """Chip-dependent tuning knobs (v5e / v6e / v7x), with a safe fallback."""
    try:
        kind = jax.devices()[0].device_kind.lower()
    except Exception:
        kind = ""
    if "v7" in kind:
        info = dict(vmem_bytes=64 << 20, num_tc=2, bf16_mxu=True)
    elif "v6" in kind:
        info = dict(vmem_bytes=128 << 20, num_tc=1, bf16_mxu=True)
    elif "v5" in kind:
        # v5e: 1 TC, no bf16 VPU/EUP -> keep f32 operands (casts cost VPU packing).
        info = dict(vmem_bytes=128 << 20, num_tc=1, bf16_mxu=False)
    else:
        info = dict(vmem_bytes=64 << 20, num_tc=1, bf16_mxu=False)
    try:
        info["vmem_bytes"] = int(pltpu.get_tpu_info().vmem_capacity_bytes)
    except Exception:
        pass
    return info


def _make_kernel(mode, soft_max, line, D, compute_dtype, approx_reciprocal):
    inv_D = 1.0 / D
    # torch.std is unbiased (ddof=1); D == 1 intentionally yields NaN like torch.
    inv_Dm1 = (1.0 / (D - 1)) if D > 1 else float("nan")

    def _inv(denom):
        if approx_reciprocal:
            return pl.reciprocal(denom, approx=True)       # EUP vrcp, ~1e-3 rel err
        return 1.0 / denom                                  # exact

    def kernel(uw_ref, gcn_ref, bias_ref, x_ref, *rest):
        if line:
            w2_ref, b2_ref, o_ref = rest
        else:
            (o_ref,) = rest

        TB, L, Dk = x_ref.shape
        C = uw_ref.shape[0]

        x = x_ref[...].astype(compute_dtype)                 # (TB, L, D)
        uw = uw_ref[...].astype(compute_dtype)               # (C, D) - no TB broadcast

        # scores[(b,l), c] = sum_d x[b,l,d] * U_w[c,d]: ONE (TB*L, D)x(D, C) matmul.
        scores = lax.dot_general(x.reshape(TB * L, Dk), uw,
                                 (((1,), (1,)), ((), ())),
                                 preferred_element_type=jnp.float32)
        scores = scores.reshape(TB, L, C)                    # (TB, L, C)

        # softmax over the sequence axis (torch dim=2 of (B, C, L) == axis 1 here)
        scores = scores - jnp.max(scores, axis=1, keepdims=True)
        e = jnp.exp(scores)
        alpha = e * _inv(jnp.sum(e, axis=1, keepdims=True))  # (TB, L, C), f32

        # m[b, c, d] = sum_l alpha[b, l, c] * x[b, l, d]
        m = jnp.einsum("blc,bld->bcd", alpha.astype(compute_dtype), x,
                       preferred_element_type=jnp.float32)   # (TB, C, D)

        g = gcn_ref[...].astype(jnp.float32)                 # (TB, C, D)
        if soft_max == 1:
            # torch.softmax(gcn_out, dim=1): over the class axis (axis 1 here)
            g = g - jnp.max(g, axis=1, keepdims=True)
            ge = jnp.exp(g)
            g = ge * _inv(jnp.sum(ge, axis=1, keepdims=True))

        z = g * m                                            # (TB, C, D)

        # compress_output(z, mode, dim=2): reduce over D (lanes) -> (TB, C)
        if mode == "mean":
            r = jnp.sum(z, axis=-1) * inv_D
        elif mode == "sum":
            r = jnp.sum(z, axis=-1)
        elif mode == "amax":
            r = jnp.max(z, axis=-1)
        elif mode == "amin":
            r = jnp.min(z, axis=-1)
        elif mode == "norm":
            r = jnp.sqrt(jnp.sum(z * z, axis=-1))
        elif mode == "std":
            mu = jnp.sum(z, axis=-1, keepdims=True) * inv_D
            r = jnp.sqrt(jnp.sum((z - mu) ** 2, axis=-1) * inv_Dm1)
        else:
            raise NotImplementedError(f"mode={mode!r} has no Pallas equivalent")

        out = r + bias_ref[...]                              # (TB, C) + (1, C)

        if line == 1:
            # lin_2: out @ W2^T + b2   (MXU, lane-dense N = C)
            out = lax.dot_general(out, w2_ref[...].astype(jnp.float32),
                                  (((1,), (1,)), ((), ())),
                                  preferred_element_type=jnp.float32) + b2_ref[...]

        o_ref[...] = out.astype(o_ref.dtype)

    return kernel


def _choose_block_batch(B, L, C, D, itemsize, vmem_bytes, num_tc):
    """Batch tile per grid step.

    Output block is (TB, C), so TB must be a multiple of 8 or equal B.  Padding of
    B is avoided by preferring TB among divisors of B (or TB = B).  Single-TC parts
    (v5e/v6e) get one fat step when it fits (the grid is a serial loop there); on
    v7x we keep >= num_tc steps so the 'parallel' batch axis feeds both TensorCores.
    """
    # double-buffered input/output tiles + f32 intermediates, per batch element
    per_batch = (2 * (L * D + C * D) * itemsize + 2 * C * 4
                 + (2 * L * C + 3 * C * D) * 4)
    budget = (28 << 20) if vmem_bytes >= (96 << 20) else (12 << 20)
    cap = max(1, min(512, budget // max(per_batch, 1)))

    if num_tc < 2 and B <= cap:
        return B                              # one fat step, no padding
    cands = [t for t in range(8, min(B, cap) + 1, 8) if B % t == 0]
    if num_tc >= 2:
        split = [t for t in cands if B // t >= num_tc]
        if split:
            return max(split)                 # biggest divisor tile feeding all TCs
    if cands:
        return max(cands)
    if B <= cap:
        return B
    return max(8, (cap // 8) * 8)             # last resort; wrapper will pad B


def normal_gcn_forward(x, gcn_out, params, *, mode="mean", soft_max=1, line=0,
                       conca=0, mxu_dtype=None, block_b=None,
                       approx_reciprocal=False):
    """x: (B, L, D), gcn_out: (B, C, D) -> (B, C) f32."""
    # TODO(synk): conca == 1 builds a fresh randomly-initialized Linear inside
    # forward() (and mode == 'both' builds fresh Conv1d/MaxPool1d); skipped.
    assert conca == 0
    B, L, D = x.shape
    C = params["U_w"].shape[0]
    assert gcn_out.shape == (B, C, D)

    chip = _chip_defaults()
    # bf16 MXU operands by default on v6e/v7x (f32 accumulation / elementwise stay
    # f32 in-kernel); f32 on v5e and unknown parts.
    if mxu_dtype is None:
        compute_dtype = jnp.bfloat16 if chip["bf16_mxu"] else jnp.float32
    else:
        compute_dtype = jnp.dtype(mxu_dtype)

    itemsize = max(x.dtype.itemsize, gcn_out.dtype.itemsize)
    TB = block_b if block_b is not None else _choose_block_batch(
        B, L, C, D, itemsize, chip["vmem_bytes"], chip["num_tc"])
    Bp = -(-B // TB) * TB
    if Bp != B:
        # Only reached when no divisor-of-B tile fits VMEM (rare): the pad costs an
        # extra HBM round trip of x / gcn_out, so _choose_block_batch avoids it.
        pad = [(0, Bp - B), (0, 0), (0, 0)]
        x = jnp.pad(x, pad)
        gcn_out = jnp.pad(gcn_out, pad)
    grid = (Bp // TB,)

    bias = params["final_b"].reshape(1, C)
    in_arrays = [params["U_w"], gcn_out, bias, x]
    # NOTE: the lambda b: (0, 0) operands are grid-invariant; single-buffering them
    # (pipeline_mode=pl.Buffered(1)) would shave a little more VMEM on v7x.
    in_specs = [
        pl.BlockSpec((C, D), lambda b: (0, 0)),           # U.weight   (shared)
        pl.BlockSpec((TB, C, D), lambda b: (b, 0, 0)),    # gcn_out    (batch tile)
        pl.BlockSpec((1, C), lambda b: (0, 0)),           # final.bias (shared)
        pl.BlockSpec((TB, L, D), lambda b: (b, 0, 0)),    # x          (batch tile)
    ]
    if line == 1:
        in_arrays += [params["lin2_w"], params["lin2_b"].reshape(1, C)]
        in_specs += [pl.BlockSpec((C, C), lambda b: (0, 0)),
                     pl.BlockSpec((1, C), lambda b: (0, 0))]

    # VMEM budget: double-buffered tiles + shared weights + f32 intermediates,
    # capped well below physical VMEM (<= 40 MiB on v7x, <= 80 MiB on v5e/v6e).
    block_bytes = (2 * TB * (L * D * x.dtype.itemsize
                             + C * D * gcn_out.dtype.itemsize)
                   + 2 * TB * C * 4
                   + TB * (2 * L * C + 3 * C * D) * 4
                   + 2 * (C * D + C + (C * C + C if line else 0)) * 4)
    vmem_limit = int(min(chip["vmem_bytes"] * 5 // 8,
                         max(24 << 20, 2 * block_bytes)))

    out = pl.pallas_call(
        _make_kernel(mode, soft_max, line, D, compute_dtype, approx_reciprocal),
        out_shape=jax.ShapeDtypeStruct((Bp, C), jnp.float32),
        grid=grid,
        in_specs=in_specs,
        out_specs=pl.BlockSpec((TB, C), lambda b: (b, 0)),
        compiler_params=pltpu.CompilerParams(
            dimension_semantics=("parallel",),
            vmem_limit_bytes=vmem_limit),
    )(*in_arrays)
    return out[:B] if Bp != B else out


def ref_forward(x, gcn_out, params, *, mode="mean", soft_max=1, line=0):
    """Pure-JAX reference mirroring the PyTorch forward."""
    g = jax.nn.softmax(gcn_out, axis=1) if soft_max == 1 else gcn_out
    alpha = jax.nn.softmax(jnp.einsum("cd,bld->bcl", params["U_w"], x), axis=2)
    m = jnp.einsum("bcl,bld->bcd", alpha, x)
    z = g * m
    if mode == "mean":
        r = jnp.mean(z, axis=2)
    elif mode == "sum":
        r = jnp.sum(z, axis=2)
    elif mode == "amax":
        r = jnp.max(z, axis=2)
    elif mode == "amin":
        r = jnp.min(z, axis=2)
    elif mode == "norm":
        r = jnp.linalg.norm(z, axis=2)
    elif mode == "std":
        r = jnp.std(z, axis=2, ddof=1)
    else:
        raise NotImplementedError(mode)
    out = r + params["final_b"]
    if line == 1:
        out = out @ params["lin2_w"].T + params["lin2_b"]
    return out


def init_params(key, rnn_dim, num_classes):
    kU, kfb, kw2, kb2 = jax.random.split(key, 4)
    # xavier_uniform_ for U.weight
    bound_u = (6.0 / (num_classes + rnn_dim)) ** 0.5
    U_w = jax.random.uniform(kU, (num_classes, rnn_dim), jnp.float32, -bound_u, bound_u)
    # nn.Linear default bias init: U(-1/sqrt(fan_in), 1/sqrt(fan_in))
    bb = 1.0 / (rnn_dim ** 0.5)
    final_b = jax.random.uniform(kfb, (num_classes,), jnp.float32, -bb, bb)
    # lin_2 = nn.Linear(50, 50) (only used when line == 1; requires num_classes == 50)
    b2 = 1.0 / (50.0 ** 0.5)
    lin2_w = jax.random.uniform(kw2, (50, 50), jnp.float32, -b2, b2)
    lin2_b = jax.random.uniform(kb2, (50,), jnp.float32, -b2, b2)
    return {"U_w": U_w, "final_b": final_b, "lin2_w": lin2_w, "lin2_b": lin2_b}


if __name__ == "__main__":
    B, L, D, C = 8, 16, 32, 50    # batch, seq_len, rnn_dim, num_classes

    key = jax.random.PRNGKey(0)
    kx, kg, kp = jax.random.split(key, 3)
    x = jax.random.normal(kx, (B, L, D), jnp.float32)
    gcn_out = jax.random.normal(kg, (B, C, D), jnp.float32)
    params = init_params(kp, D, C)

    chip = _chip_defaults()
    configs = [dict(mode="mean", soft_max=1, line=0),
               dict(mode="std", soft_max=1, line=1),
               dict(mode="sum", soft_max=0, line=0)]
    for cfg in configs:
        ref = ref_forward(x, gcn_out, params, **cfg)

        # Tight accuracy check: f32 MXU operands, exact reciprocals.
        out = jax.block_until_ready(
            normal_gcn_forward(x, gcn_out, params, mxu_dtype=jnp.float32, **cfg))
        assert out.shape == (B, C), (cfg, out.shape)
        err = float(jnp.max(jnp.abs(out - ref)))
        assert jnp.allclose(out, ref, atol=1e-4, rtol=1e-4), (cfg, err)

        # Chip-default fast path (bf16 MXU operands on v6e/v7x): looser tolerance.
        out_fast = jax.block_until_ready(normal_gcn_forward(x, gcn_out, params, **cfg))
        tol = 5e-2 if chip["bf16_mxu"] else 1e-4
        assert out_fast.shape == (B, C), (cfg, out_fast.shape)
        assert jnp.allclose(out_fast, ref, atol=tol, rtol=tol), cfg

    print("KERNEL_OK")
</pallas_src>

<mosaic_0001>
module attributes {stable_mosaic.version = 11 : i64} {
  func.func @kernel(%arg0: i32, %arg1: memref<50x32xf32, #tpu.memory_space<vmem>>, %arg2: memref<8x50x32xf32, #tpu.memory_space<vmem>>, %arg3: memref<1x50xf32, #tpu.memory_space<vmem>>, %arg4: memref<8x16x32xf32, #tpu.memory_space<vmem>>, %arg5: memref<8x50xf32, #tpu.memory_space<vmem>>) attributes {dimension_semantics = [#tpu.dimension_semantics<parallel>], iteration_bounds = array<i64: 1>, scalar_prefetch = 0 : i64, scratch_operands = 0 : i64, tpu.core_type = #tpu.core_type<tc>, window_params = [{pipeline_mode = #tpu.pipeline_mode<synchronous>, transform_indices = @transform_0, window_bounds = array<i64: 50, 32>}, {transform_indices = @transform_1, window_bounds = array<i64: 8, 50, 32>}, {pipeline_mode = #tpu.pipeline_mode<synchronous>, transform_indices = @transform_2, window_bounds = array<i64: 1, 50>}, {transform_indices = @transform_3, window_bounds = array<i64: 8, 16, 32>}, {transform_indices = @transform_4, window_bounds = array<i64: 8, 50>}]} {
    %c0 = arith.constant 0 : index
    %c0_0 = arith.constant 0 : index
    %c0_1 = arith.constant 0 : index
    %0 = vector.load %arg4[%c0, %c0_0, %c0_1] : memref<8x16x32xf32, #tpu.memory_space<vmem>>, vector<8x16x32xf32>
    %c0_2 = arith.constant 0 : index
    %c0_3 = arith.constant 0 : index
    %1 = vector.load %arg1[%c0_2, %c0_3] : memref<50x32xf32, #tpu.memory_space<vmem>>, vector<50x32xf32>
    %2 = vector.shape_cast %0 : vector<8x16x32xf32> to vector<128x32xf32>
    %cst = arith.constant dense<0.000000e+00> : vector<128x50xf32>
    %3 = tpu.matmul %2, %1, %cst {dimension_numbers = #tpu.dot_dimension_numbers<[1], [1], [0], [0], [0, 0, 1, 0], [], []>} : vector<128x32xf32>, vector<50x32xf32>, vector<128x50xf32> -> vector<128x50xf32>
    %4 = vector.shape_cast %3 : vector<128x50xf32> to vector<8x16x50xf32>
    %cst_4 = arith.constant dense<0xFF800000> : vector<8x50xf32>
    %5 = vector.multi_reduction <maximumf>, %4, %cst_4 [1] : vector<8x16x50xf32> to vector<8x50xf32>
    %6 = vector.shape_cast %5 : vector<8x50xf32> to vector<8x1x50xf32>
    %7 = vector.broadcast %6 : vector<8x1x50xf32> to vector<8x16x50xf32>
    %8 = arith.subf %4, %7 : vector<8x16x50xf32>
    %9 = math.exp %8 : vector<8x16x50xf32>
    %cst_5 = arith.constant dense<0.000000e+00> : vector<8x50xf32>
    %10 = vector.multi_reduction <add>, %9, %cst_5 [1] : vector<8x16x50xf32> to vector<8x50xf32>
    %11 = vector.shape_cast %10 : vector<8x50xf32> to vector<8x1x50xf32>
    %cst_6 = arith.constant 1.000000e+00 : f32
    %12 = vector.broadcast %cst_6 : f32 to vector<8x1x50xf32>
    %13 = arith.divf %12, %11 : vector<8x1x50xf32>
    %14 = vector.broadcast %13 : vector<8x1x50xf32> to vector<8x16x50xf32>
    %15 = arith.mulf %9, %14 : vector<8x16x50xf32>
    "tpu.trace_start"() <{level = 10 : i32, message = "blc,bld->bcd"}> : () -> ()
    %cst_7 = arith.constant dense<0.000000e+00> : vector<8x50x32xf32>
    %16 = tpu.matmul %15, %0, %cst_7 {dimension_numbers = #tpu.dot_dimension_numbers<[1], [1], [2], [2], [0, 0, 0, 2, 1, 2], [0], [0]>} : vector<8x16x50xf32>, vector<8x16x32xf32>, vector<8x50x32xf32> -> vector<8x50x32xf32>
    "tpu.trace_stop"() : () -> ()
    %c0_8 = arith.constant 0 : index
    %c0_9 = arith.constant 0 : index
    %c0_10 = arith.constant 0 : index
    %17 = vector.load %arg2[%c0_8, %c0_9, %c0_10] : memref<8x50x32xf32, #tpu.memory_space<vmem>>, vector<8x50x32xf32>
    %cst_11 = arith.constant dense<0xFF800000> : vector<8x32xf32>
    %18 = vector.multi_reduction <maximumf>, %17, %cst_11 [1] : vector<8x50x32xf32> to vector<8x32xf32>
    %19 = vector.shape_cast %18 : vector<8x32xf32> to vector<8x1x32xf32>
    %20 = vector.broadcast %19 : vector<8x1x32xf32> to vector<8x50x32xf32>
    %21 = arith.subf %17, %20 : vector<8x50x32xf32>
    %22 = math.exp %21 : vector<8x50x32xf32>
    %cst_12 = arith.constant dense<0.000000e+00> : vector<8x32xf32>
    %23 = vector.multi_reduction <add>, %22, %cst_12 [1] : vector<8x50x32xf32> to vector<8x32xf32>
    %24 = vector.shape_cast %23 : vector<8x32xf32> to vector<8x1x32xf32>
    %cst_13 = arith.constant 1.000000e+00 : f32
    %25 = vector.broadcast %cst_13 : f32 to vector<8x1x32xf32>
    %26 = arith.divf %25, %24 : vector<8x1x32xf32>
    %27 = vector.broadcast %26 : vector<8x1x32xf32> to vector<8x50x32xf32>
    %28 = arith.mulf %22, %27 : vector<8x50x32xf32>
    %29 = arith.mulf %28, %16 : vector<8x50x32xf32>
    %cst_14 = arith.constant dense<0.000000e+00> : vector<8x50xf32>
    %30 = vector.multi_reduction <add>, %29, %cst_14 [2] : vector<8x50x32xf32> to vector<8x50xf32>
    %cst_15 = arith.constant 3.125000e-02 : f32
    %31 = vector.broadcast %cst_15 : f32 to vector<8x50xf32>
    %32 = arith.mulf %30, %31 : vector<8x50xf32>
    %c0_16 = arith.constant 0 : index
    %c0_17 = arith.constant 0 : index
    %33 = vector.load %arg3[%c0_16, %c0_17] : memref<1x50xf32, #tpu.memory_space<vmem>>, vector<1x50xf32>
    %34 = vector.broadcast %33 : vector<1x50xf32> to vector<8x50xf32>
    %35 = arith.addf %32, %34 : vector<8x50xf32>
    %c0_18 = arith.constant 0 : index
    %c0_19 = arith.constant 0 : index
    %36 = vector.load %arg5[%c0_18, %c0_19] : memref<8x50xf32, #tpu.memory_space<vmem>>, vector<8x50xf32>
    tpu.vector_store %arg5[%c0_18, %c0_19], %35 {strides = array<i32>} : memref<8x50xf32, #tpu.memory_space<vmem>>, vector<8x50xf32>,
    return
  }
  func.func @transform_0(%arg0: i32) -> (i32, i32) {
    %c0_i32 = arith.constant 0 : i32
    %c0_i32_0 = arith.constant 0 : i32
    %c0_i32_1 = arith.constant 0 : i32
    return %c0_i32, %c0_i32_0 : i32, i32
  }
  func.func @transform_1(%arg0: i32) -> (i32, i32, i32) {
    %c0_i32 = arith.constant 0 : i32
    %c0_i32_0 = arith.constant 0 : i32
    %c0_i32_1 = arith.constant 0 : i32
    return %arg0, %c0_i32, %c0_i32_0 : i32, i32, i32
  }
  func.func @transform_2(%arg0: i32) -> (i32, i32) {
    %c0_i32 = arith.constant 0 : i32
    %c0_i32_0 = arith.constant 0 : i32
    %c0_i32_1 = arith.constant 0 : i32
    return %c0_i32, %c0_i32_0 : i32, i32
  }
  func.func @transform_3(%arg0: i32) -> (i32, i32, i32) {
    %c0_i32 = arith.constant 0 : i32
    %c0_i32_0 = arith.constant 0 : i32
    %c0_i32_1 = arith.constant 0 : i32
    return %arg0, %c0_i32, %c0_i32_0 : i32, i32, i32
  }
  func.func @transform_4(%arg0: i32) -> (i32, i32) {
    %c0_i32 = arith.constant 0 : i32
    %c0_i32_0 = arith.constant 0 : i32
    return %arg0, %c0_i32 : i32, i32
  }
}

</mosaic_0001>

<bundles_post_ra>
// kernel: tpu_custom_call.1
= control target key start
LH: loop header
LB: loop body
LE: loop exit
PB: predicated region body
PF: predicated region fallthrough
CT: control target
= control target key end

     0   :  { %vm41_vm0 = vcmask 261120   ;;  %s5590_s0 = inlined_call_operand.vmem [shape: f32[50,32], index: 0, kind: input, shape index: {}]   ;;  %s5591_s1 = inlined_call_operand.vmem [shape: f32[8,50,32], index: 1, kind: input, shape index: {}]   ;;  %s5592_s2 = inlined_call_operand.vmem [shape: f32[1,50], index: 2, kind: input, shape index: {}]   ;;  %s5593_s3 = inlined_call_operand.vmem [shape: f32[8,16,32], index: 3, kind: input, shape index: {}]   ;;  %s5594_s4 = inlined_call_operand.hbm [shape: f32[8,50], index: 4, kind: output, shape index: {}]  }
   0x1   :  { %v34_v0 = vld [vmem:[%s5590_s0] sm:$0xff]  ;;  %v35_v1 = vld [vmem:[%s5590_s0 + $0x8] sm:$0xff]  ;;  %v36_v2 = vld [vmem:[%s5590_s0 + $0x10] sm:$0xff] }
   0x2   :  { %v3636_v3 = vpack.c.bf16 %v35_v1, %v34_v0  ;;  %vm3926_vm1 = vmpackc.low %vm41_vm0, %vm41_vm0  ;;  %v37_v5 = vld [vmem:[%s5590_s0 + $0x18] sm:$0xff]  ;;  %v3936_v7 = vld [vmem:[%s5593_s3] sm:$0xff] }
   0x3   :  { %v3642_v6 = vpack.c.bf16 %v37_v5, %v36_v2  ;;  %3412 = vmatprep.mubr.msk.f32.mxu0 %vm41_vm0, %v3936_v7  ;;  %v3945_v8 = vld [vmem:[%s5593_s3 + $0x10] sm:$0xff]  ;;  %v3950_v9 = vld [vmem:[%s5593_s3 + $0x18] sm:$0xff]  ;;  %v38_v10 = vld [vmem:[%s5590_s0 + $0x20] sm:$0xff] }
   0x4   :  { %3638 = vmatprep.subr.msk.bf16.mxu0 %vm3926_vm1, %v3636_v3  ;;  %v39_v11 = vld [vmem:[%s5590_s0 + $0x28] sm:$0xff]  ;;  %v3658_v12 = vpack.c.bf16 %v3950_v9, %v3945_v8  ;;  %v3965_v13 = vld [vmem:[%s5593_s3 + $0x20] sm:$0xff]  ;;  %v3975_v15 = vld [vmem:[%s5593_s3 + $0x30] sm:$0xff] }
   0x5   :  { %3641 = vmatpush3.bf16.xpose.msk.msra.mxu0 %vm3926_vm1, %v3636_v3  ;;  %v3970_v14 = vld [vmem:[%s5593_s3 + $0x28] sm:$0xff]  ;;  %v3984_v17 = vld [vmem:[%s5593_s3 + $0x38] sm:$0xff]  ;;  %v3989_v18 = vld [vmem:[%s5593_s3 + $0x40] sm:$0xff] }
   0x6   :  { %3644 = vmatprep.subr.msk.bf16.mxu0 %vm3926_vm1, %v3642_v6  ;;  %v3661_v16 = vpack.c.bf16 %v3970_v14, %v3965_v13  ;;  %v3994_v19 = vld [vmem:[%s5593_s3 + $0x48] sm:$0xff]  ;;  %v3664_v20 = vpack.c.bf16 %v3984_v17, %v3975_v15  ;;  %v4003_v22 = vld [vmem:[%s5593_s3 + $0x50] sm:$0xff]  ;;  %v4008_v23 = vld [vmem:[%s5593_s3 + $0x58] sm:$0xff] }
   0x7   :  { %v3667_v21 = vpack.c.bf16 %v3994_v19, %v3989_v18  ;;  %v4013_v24 = vld [vmem:[%s5593_s3 + $0x60] sm:$0xff]  ;;  %v3670_v25 = vpack.c.bf16 %v4008_v23, %v4003_v22  ;;  %v4020_v26 = vld [vmem:[%s5593_s3 + $0x68] sm:$0xff]  ;;  %v4025_v27 = vld [vmem:[%s5593_s3 + $0x70] sm:$0xff] }
   0x8   :  { %v4030_v28 = vld [vmem:[%s5593_s3 + $0x78] sm:$0xff]  ;;  %v3673_v29 = vpack.c.bf16 %v4020_v26, %v4013_v24 }
   0x9   :  { %v3676_v30 = vpack.c.bf16 %v4030_v28, %v4025_v27 }
   0xa   :  { %9 = vsyncpa [#allocation3], 0  ;;  %v3648_v31 = vpack.c.bf16 %v39_v11, %v38_v10  ;;  %v40_v32 = vld [vmem:[%s5590_s0 + $0x30] sm:$0x3]  ;;  %v4050_v33 = vld [vmem:[%s5593_s3 + $0x8] sm:$0xff]  ;;  %vm256_vm2 = vcmask 408576  }
   0xb   :  { %v3655_v3 = vpack.c.bf16 %v4050_v33, %v3936_v7  ;;  %vm3886_vm3 = vmmov 0   ;;  %vm513_vm4 = vcmask 130048   ;;  %vm1773_vm5 = vcmask 254976  }
   0xc   :  { %vm2918_vm6 = vcmask 130112   ;;  %vm2925_vm7 = vcmask 195712   ;;  %vm2932_vm8 = vcmask 261312   ;;  %vm2939_vm9 = vcmask 326912  }
   0xd   :  { %3647 = vmatpush3.bf16.xpose.msk.msra.mxu0 %vm3926_vm1, %v3642_v6  ;;  %vm2946_vm10 = vcmask 392512   ;;  %vm2953_vm11 = vcmask 458112   ;;  %vm3193_vm12 = vcmask 1041409   ;;  %vm3195_vm13 = vcmask 1042434  }
   0xe   :  { %3650 = vmatprep.subr.msk.bf16.mxu0 %vm3926_vm1, %v3648_v31  ;;  %vm3197_vm14 = vcmask 1043459   ;;  %vm3199_vm15 = vcmask 1044484  }
  0x15   :  { %3653 = vmatpush3.bf16.xpose.msk.msra.mxu0 %vm3926_vm1, %v3648_v31  ;;  %v3885_v31 = vmov 0.0|0.0   ;;  %vm3203_vm1 = vcmask 1046534  }
  0x16   :  { %3410 = vmatprep.subr.msk.mxu0 %vm41_vm0, %v40_v32  ;;  %3654 = vmatprep.subr.bf16.mxu1 %v3885_v31 }
  0x17   :  { %3656 = vmatpush3.bf16.msra.mxu1 %v3655_v3 }
  0x18   :  { %3657 = vmatprep.subr.bf16.mxu1 %v3885_v31 }
  0x1d   :  { %3411 = vmatpush3.xpose.msk.msra.mxu0 %vm41_vm0, %v40_v32 }
  0x1e   :  { %3660 = vmatprep.subr.bf16.mxu0 %v3885_v31 }
  0x20   :  { %3413 = vmatmul.mubr.msk.f32.vlgmr.msra.gmra.mrb[0].mxu0 %vm41_vm0, %v4050_v33 }
  0x21   :  { %3415 = vmatprep.mubr.msk.f32.mxu0 %vm41_vm0, %v3945_v8  ;;  %3662 = vmatpush3.bf16.msra.mxu0 %v3661_v16  ;;  %v3302_v8 = vld [vmem:[%s5592_s2] ss:$0 sm:$0xff] }
  0x22   :  { %3666 = vmatprep.subr.bf16.mxu0 %v3885_v31 }
  0x24   :  { %3416 = vmatmul.mubr.msk.f32.gmra.mrb[2].mxu0 %vm41_vm0, %v3950_v9 }
  0x25   :  { %3418 = vmatprep.mubr.msk.f32.mxu0 %vm41_vm0, %v3965_v13 }
  0x28   :  { %3419 = vmatmul.mubr.msk.f32.gmra.mrb[4].mxu0 %vm41_vm0, %v3970_v14 }
  0x29   :  { %3421 = vmatprep.mubr.msk.f32.mxu0 %vm41_vm0, %v3975_v15 }
  0x2c   :  { %3422 = vmatmul.mubr.msk.f32.gmra.mrb[6].mxu0 %vm41_vm0, %v3984_v17 }
  0x2d   :  { %3424 = vmatprep.mubr.msk.f32.mxu0 %vm41_vm0, %v3989_v18 }
  0x30   :  { %3425 = vmatmul.mubr.msk.f32.gmra.mrb[8].mxu0 %vm41_vm0, %v3994_v19 }
  0x31   :  { %3427 = vmatprep.mubr.msk.f32.mxu0 %vm41_vm0, %v4003_v22 }
  0x34   :  { %3428 = vmatmul.mubr.msk.f32.gmra.mrb[10].mxu0 %vm41_vm0, %v4008_v23 }
  0x35   :  { %3430 = vmatprep.mubr.msk.f32.mxu0 %vm41_vm0, %v4013_v24  ;;  %v4329_v24 = vld [vmem:[%s5591_s1] sm:$0xff] }
  0x38   :  { %3431 = vmatmul.mubr.msk.f32.gmra.mrb[12].mxu0 %vm41_vm0, %v4020_v26 }
  0x39   :  { %3433 = vmatprep.mubr.msk.f32.mxu0 %vm41_vm0, %v4025_v27 }
  0x3c   :  { %3434 = vmatmul.mubr.msk.f32.gmra.mrb[14].mxu0 %vm41_vm0, %v4030_v28 }
  0xf3   :  { %v3414_v34 = vpop.f32.mrb[0].mxu0 }
  0xf4   :  { %v258_v35 = vsel %vm256_vm2, %v3414_v34, -inf  ;;  %v177_v36 = vpop.f32.mrb[1].mxu0 }
  0xf5   :  { %v257_v37 = vsel %vm256_vm2, %v177_v36, -inf }
  0xf6   :  { %v259_v38 = vmax.f32 %v257_v37, %v258_v35 }
  0xf7   :  { %v4084_v39 = vpop.f32.mrb[2].mxu0 }
  0xf8   :  { %v260_v40 = vrot.slane %v259_v38, 4  ;;  %v267_v41 = vsel %vm256_vm2, %v4084_v39, -inf  ;;  %v187_v42 = vpop.f32.mrb[3].mxu0 }
  0xf9   :  { %v266_v43 = vsel %vm256_vm2, %v187_v42, -inf }
  0xfa   :  { %v261_v44 = vmax.f32 %v259_v38, %v260_v40  ;;  %v268_v45 = vmax.f32 %v266_v43, %v267_v41  ;;  %v3887_v38 = vmov 0.0  }
  0xfb   :  { %v4089_v46 = vpop.f32.mrb[4].mxu0  ;;  %3440 = vmatprep.mubr.msk.f32.mxu1 %vm3886_vm3, %v3887_v38  ;;  %3490 = vmatprep.mubr.msk.f32.mxu0 %vm3886_vm3, %v3887_v38 }
  0xfc   :  { %v262_v47 = vrot.slane %v261_v44, 2  ;;  %v269_v48 = vrot.slane %v268_v45, 4  ;;  %v276_v49 = vsel %vm256_vm2, %v4089_v46, -inf  ;;  %v4093_v50 = vpop.f32.mrb[5].mxu0 }
  0xfd   :  { %v275_v51 = vsel %vm256_vm2, %v4093_v50, -inf }
  0xfe   :  { %v263_v52 = vmax.f32 %v261_v44, %v262_v47  ;;  %v270_v53 = vmax.f32 %v268_v45, %v269_v48  ;;  %v277_v54 = vmax.f32 %v275_v51, %v276_v49 }
  0xff   :  { %v4097_v55 = vpop.f32.mrb[6].mxu0 }
 0x100   :  { %v264_v56 = vrot.slane %v263_v52, 1  ;;  %v271_v57 = vrot.slane %v270_v53, 2  ;;  %v278_v58 = vrot.slane %v277_v54, 4  ;;  %v285_v59 = vsel %vm256_vm2, %v4097_v55, -inf  ;;  %v4101_v60 = vpop.f32.mrb[7].mxu0 }
 0x101   :  { %v284_v61 = vsel %vm256_vm2, %v4101_v60, -inf }
 0x102   :  { %v265_v62 = vmax.f32 %v263_v52, %v264_v56  ;;  %v272_v63 = vmax.f32 %v270_v53, %v271_v57  ;;  %v279_v0 = vmax.f32 %v277_v54, %v278_v58  ;;  %v286_v1 = vmax.f32 %v284_v61, %v285_v59 }
 0x103   :  { %v4105_v2 = vpop.f32.mrb[8].mxu0 }
 0x104   :  { %v329_v4 = vsub.f32 %v177_v36, %v265_v62  ;;  %v330_v5 = vsub.f32 %v3414_v34, %v265_v62  ;;  %v273_v6 = vrot.slane %v272_v63, 1  ;;  %v280_v10 = vrot.slane %v279_v0, 2  ;;  %v4109_v11 = vpop.f32.mrb[9].mxu0 }
 0x105   :  { %v287_v32 = vrot.slane %v286_v1, 4  ;;  %v294_v35 = vsel %vm256_vm2, %v4105_v2, -inf  ;;  %v293_v37 = vsel %vm256_vm2, %v4109_v11, -inf }
 0x106   :  { %v345_v7 = vmul.f32 1.442695, %v329_v4  ;;  %v347_v33 = vmul.f32 1.442695, %v330_v5  ;;  %v274_v34 = vmax.f32 %v272_v63, %v273_v6  ;;  %v281_v36 = vmax.f32 %v279_v0, %v280_v10 }
 0x107   :  { %v288_v40 = vmax.f32 %v286_v1, %v287_v32  ;;  %v295_v41 = vmax.f32 %v293_v37, %v294_v35  ;;  %v4123_v43 = vpop.f32.mrb[10].mxu0 }
 0x108   :  { %3685 = vpow2.f32 %v345_v7  ;;  %v331_v13 = vsub.f32 %v187_v42, %v274_v34  ;;  %v332_v14 = vsub.f32 %v4084_v39, %v274_v34  ;;  %v282_v16 = vrot.slane %v281_v36, 1  ;;  %v4129_v44 = vpop.f32.mrb[11].mxu0 }
 0x109   :  { %3687 = vpow2.f32 %v347_v33  ;;  %v289_v45 = vrot.slane %v288_v40, 2  ;;  %v296_v47 = vrot.slane %v295_v41, 4  ;;  %v303_v48 = vsel %vm256_vm2, %v4123_v43, -inf }
 0x10a   :  { %v349_v49 = vmul.f32 1.442695, %v331_v13  ;;  %v351_v51 = vmul.f32 1.442695, %v332_v14  ;;  %v283_v52 = vmax.f32 %v281_v36, %v282_v16  ;;  %v302_v53 = vsel %vm256_vm2, %v4129_v44, -inf }
 0x10b   :  { %v290_v54 = vmax.f32 %v288_v40, %v289_v45  ;;  %v297_v56 = vmax.f32 %v295_v41, %v296_v47  ;;  %v304_v42 = vmax.f32 %v302_v53, %v303_v48  ;;  %v4135_v57 = vpop.f32.mrb[12].mxu0 }
 0x10c   :  { %3689 = vpow2.f32 %v349_v49  ;;  %v333_v39 = vsub.f32 %v4093_v50, %v283_v52  ;;  %v334_v58 = vsub.f32 %v4089_v46, %v283_v52  ;;  %v312_v59 = vsel %vm256_vm2, %v4135_v57, -inf  ;;  %v4141_v61 = vpop.f32.mrb[13].mxu0 }
 0x10d   :  { %3691 = vpow2.f32 %v351_v51  ;;  %v291_v62 = vrot.slane %v290_v54, 1  ;;  %v298_v63 = vrot.slane %v297_v56, 2  ;;  %v305_v0 = vrot.slane %v304_v42, 4 }
 0x10e   :  { %v353_v1 = vmul.f32 1.442695, %v333_v39  ;;  %v355_v3 = vmul.f32 1.442695, %v334_v58  ;;  %v311_v4 = vsel %vm256_vm2, %v4141_v61, -inf }
 0x10f   :  { %v292_v5 = vmax.f32 %v290_v54, %v291_v62  ;;  %v299_v6 = vmax.f32 %v297_v56, %v298_v63  ;;  %v306_v10 = vmax.f32 %v304_v42, %v305_v0  ;;  %v313_v50 = vmax.f32 %v311_v4, %v312_v59  ;;  %v4145_v32 = vpop.f32.mrb[14].mxu0 }
 0x110   :  { %3693 = vpow2.f32 %v353_v1  ;;  %v321_v46 = vsel %vm256_vm2, %v4145_v32, -inf  ;;  %v4149_v35 = vpop.f32.mrb[15].mxu0 }
 0x111   :  { %3695 = vpow2.f32 %v355_v3  ;;  %v335_v37 = vsub.f32 %v4101_v60, %v292_v5  ;;  %v336_v7 = vsub.f32 %v4097_v55, %v292_v5  ;;  %v300_v33 = vrot.slane %v299_v6, 1 }
 0x112   :  { %v4153_v34 = vpop.eup %3685  ;;  %v307_v36 = vrot.slane %v306_v10, 2  ;;  %v314_v40 = vrot.slane %v313_v50, 4  ;;  %v320_v41 = vsel %vm256_vm2, %v4149_v35, -inf }
 0x113   :  { %v4157_v13 = vpop.eup %3687  ;;  %v377_v14 = vsel %vm256_vm2, %v4153_v34, 0.0  ;;  %v357_v16 = vmul.f32 1.442695, %v335_v37  ;;  %v359_v45 = vmul.f32 1.442695, %v336_v7  ;;  %v301_v47 = vmax.f32 %v299_v6, %v300_v33 }
 0x114   :  { %v378_v60 = vsel %vm256_vm2, %v4157_v13, 0.0  ;;  %v308_v55 = vmax.f32 %v306_v10, %v307_v36  ;;  %v315_v48 = vmax.f32 %v313_v50, %v314_v40  ;;  %v322_v49 = vmax.f32 %v320_v41, %v321_v46 }
 0x115   :  { %v379_v51 = vadd.f32 %v378_v60, %v377_v14  ;;  %3697 = vpow2.f32 %v357_v16  ;;  %v337_v52 = vsub.f32 %v4109_v11, %v301_v47  ;;  %v338_v53 = vsub.f32 %v4105_v2, %v301_v47 }
 0x116   :  { %v4165_v54 = vpop.eup %3689  ;;  %3699 = vpow2.f32 %v359_v45  ;;  %v309_v56 = vrot.slane %v308_v55, 1  ;;  %v316_v42 = vrot.slane %v315_v48, 2  ;;  %v323_v39 = vrot.slane %v322_v49, 4 }
 0x117   :  { %v4167_v58 = vpop.eup %3691  ;;  %v380_v59 = vrot.slane %v379_v51, 4  ;;  %v386_v62 = vsel %vm256_vm2, %v4165_v54, 0.0  ;;  %v361_v63 = vmul.f32 1.442695, %v337_v52  ;;  %v363_v0 = vmul.f32 1.442695, %v338_v53 }
 0x118   :  { %v387_v1 = vsel %vm256_vm2, %v4167_v58, 0.0  ;;  %v310_v11 = vmax.f32 %v308_v55, %v309_v56  ;;  %v317_v3 = vmax.f32 %v315_v48, %v316_v42  ;;  %v324_v2 = vmax.f32 %v322_v49, %v323_v39 }
 0x119   :  { %v388_v4 = vadd.f32 %v387_v1, %v386_v62  ;;  %3701 = vpow2.f32 %v361_v63  ;;  %v381_v5 = vadd.f32 %v380_v59, %v379_v51 }
 0x11a   :  { %v4173_v6 = vpop.eup %3693  ;;  %3703 = vpow2.f32 %v363_v0  ;;  %v339_v10 = vsub.f32 %v4129_v44, %v310_v11  ;;  %v340_v50 = vsub.f32 %v4123_v43, %v310_v11  ;;  %v318_v46 = vrot.slane %v317_v3, 1 }
 0x11b   :  { %v4177_v37 = vpop.eup %3695  ;;  %v389_v7 = vrot.slane %v388_v4, 4  ;;  %v395_v33 = vsel %vm256_vm2, %v4173_v6, 0.0  ;;  %v382_v36 = vrot.slane %v381_v5, 2  ;;  %v325_v40 = vrot.slane %v324_v2, 2 }
 0x11c   :  { %v396_v41 = vsel %vm256_vm2, %v4177_v37, 0.0  ;;  %v365_v14 = vmul.f32 1.442695, %v339_v10  ;;  %v367_v16 = vmul.f32 1.442695, %v340_v50  ;;  %v319_v45 = vmax.f32 %v317_v3, %v318_v46 }
 0x11d   :  { %v397_v47 = vadd.f32 %v396_v41, %v395_v33  ;;  %v383_v60 = vadd.f32 %v382_v36, %v381_v5  ;;  %v390_v44 = vadd.f32 %v389_v7, %v388_v4  ;;  %v326_v55 = vmax.f32 %v324_v2, %v325_v40 }
 0x11e   :  { %3705 = vpow2.f32 %v365_v14  ;;  %v341_v43 = vsub.f32 %v4141_v61, %v319_v45  ;;  %v342_v48 = vsub.f32 %v4135_v57, %v319_v45 }
 0x11f   :  { %v4185_v49 = vpop.eup %3697  ;;  %v398_v51 = vrot.slane %v397_v47, 4  ;;  %3707 = vpow2.f32 %v367_v16  ;;  %v384_v52 = vrot.slane %v383_v60, 1  ;;  %v391_v53 = vrot.slane %v390_v44, 2 }
 0x120   :  { %v4187_v56 = vpop.eup %3699  ;;  %v404_v42 = vsel %vm256_vm2, %v4185_v49, 0.0  ;;  %v369_v39 = vmul.f32 1.442695, %v341_v43  ;;  %v371_v59 = vmul.f32 1.442695, %v342_v48  ;;  %v327_v62 = vrot.slane %v326_v55, 1 }
 0x121   :  { %v399_v63 = vadd.f32 %v398_v51, %v397_v47  ;;  %v405_v61 = vsel %vm256_vm2, %v4187_v56, 0.0  ;;  %v385_v0 = vadd.f32 %v384_v52, %v383_v60  ;;  %v392_v57 = vadd.f32 %v391_v53, %v390_v44 }
 0x122   :  { %v406_v1 = vadd.f32 %v405_v61, %v404_v42  ;;  %3709 = vpow2.f32 %v369_v39  ;;  %v328_v11 = vmax.f32 %v326_v55, %v327_v62 }
 0x123   :  { %v4193_v3 = vpop.eup %3701  ;;  %3711 = vpow2.f32 %v371_v59  ;;  %v393_v2 = vrot.slane %v392_v57, 1  ;;  %v400_v4 = vrot.slane %v399_v63, 2 }
 0x124   :  { %v4195_v5 = vpop.eup %3703  ;;  %v407_v10 = vrot.slane %v406_v1, 4  ;;  %v413_v50 = vsel %vm256_vm2, %v4193_v3, 0.0  ;;  %3713 = vrcp.f32 %v385_v0  ;;  %v343_v46 = vsub.f32 %v4149_v35, %v328_v11 }
 0x125   :  { %v414_v7 = vsel %vm256_vm2, %v4195_v5, 0.0  ;;  %v394_v33 = vadd.f32 %v393_v2, %v392_v57  ;;  %v344_v36 = vsub.f32 %v4145_v32, %v328_v11  ;;  %v401_v40 = vadd.f32 %v400_v4, %v399_v63 }
 0x126   :  { %v408_v41 = vadd.f32 %v407_v10, %v406_v1  ;;  %v415_v14 = vadd.f32 %v414_v7, %v413_v50  ;;  %v373_v16 = vmul.f32 1.442695, %v343_v46 }
 0x127   :  { %3715 = vrcp.f32 %v394_v33  ;;  %v375_v45 = vmul.f32 1.442695, %v344_v36  ;;  %v402_v47 = vrot.slane %v401_v40, 1 }
 0x128   :  { %v4203_v60 = vpop.eup %3705  ;;  %v416_v44 = vrot.slane %v415_v14, 4  ;;  %3717 = vpow2.f32 %v373_v16  ;;  %v409_v55 = vrot.slane %v408_v41, 2 }
 0x129   :  { %v4205_v43 = vpop.eup %3707  ;;  %v422_v35 = vsel %vm256_vm2, %v4203_v60, 0.0  ;;  %3719 = vpow2.f32 %v375_v45  ;;  %v403_v48 = vadd.f32 %v402_v47, %v401_v40 }
 0x12a   :  { %v417_v32 = vadd.f32 %v416_v44, %v415_v14  ;;  %v423_v51 = vsel %vm256_vm2, %v4205_v43, 0.0  ;;  %v410_v52 = vadd.f32 %v409_v55, %v408_v41 }
 0x12b   :  { %v424_v53 = vadd.f32 %v423_v51, %v422_v35  ;;  %3721 = vrcp.f32 %v403_v48 }
 0x12c   :  { %v3710_v42 = vpop.eup %3709  ;;  %v411_v39 = vrot.slane %v410_v52, 1  ;;  %v418_v59 = vrot.slane %v417_v32, 2 }
 0x12d   :  { %v3712_v62 = vpop.eup %3711  ;;  %v425_v63 = vrot.slane %v424_v53, 4  ;;  %v431_v61 = vsel %vm256_vm2, %v3710_v42, 0.0 }
 0x12e   :  { %v3714_v0 = vpop.eup %3713  ;;  %v432_v57 = vsel %vm256_vm2, %v3712_v62, 0.0  ;;  %v412_v1 = vadd.f32 %v411_v39, %v410_v52  ;;  %v419_v11 = vadd.f32 %v418_v59, %v417_v32 }
 0x12f   :  { %v426_v2 = vadd.f32 %v425_v63, %v424_v53  ;;  %v433_v4 = vadd.f32 %v432_v57, %v431_v61  ;;  %v465_v10 = vmul.f32 %v3714_v0, %v4153_v34  ;;  %v466_v50 = vmul.f32 %v3714_v0, %v4157_v13 }
 0x130   :  { %3723 = vrcp.f32 %v412_v1  ;;  %v420_v46 = vrot.slane %v419_v11, 1 }
 0x131   :  { %v3716_v7 = vpop.eup %3715  ;;  %v434_v33 = vrot.slane %v433_v4, 4  ;;  %481 = vxpose.xlu0.b32.start [1/2] (short) (narrow) %v465_v10, 56  ;;  %v427_v36 = vrot.slane %v426_v2, 2 }
 0x132   :  { %v3718_v40 = vpop.eup %3717  ;;  %v467_v41 = vmul.f32 %v3716_v7, %v4165_v54  ;;  %v468_v14 = vmul.f32 %v3716_v7, %v4167_v58  ;;  %v421_v16 = vadd.f32 %v420_v46, %v419_v11 }
 0x133   :  { %v3720_v45 = vpop.eup %3719  ;;  %v435_v47 = vadd.f32 %v434_v33, %v433_v4  ;;  %v440_v44 = vsel %vm256_vm2, %v3718_v40, 0.0  ;;  %v428_v55 = vadd.f32 %v427_v36, %v426_v2 }
 0x134   :  { %635 = vxpose.xlu1.b32.start [1/2] (short) (narrow) %v467_v41, 56  ;;  %v441_v34 = vsel %vm256_vm2, %v3720_v45, 0.0  ;;  %3725 = vrcp.f32 %v421_v16 }
 0x135   :  { %v3722_v13 = vpop.eup %3721  ;;  %482 = vxpose.xlu0.b32.end [2/2] (short) (narrow) %v466_v50, 56  ;;  %v442_v35 = vadd.f32 %v441_v34, %v440_v44  ;;  %v429_v48 = vrot.slane %v428_v55, 1  ;;  %v436_v32 = vrot.slane %v435_v47, 2 }
 0x136   :  { %v469_v51 = vmul.f32 %v3722_v13, %v4173_v6  ;;  %v470_v54 = vmul.f32 %v3722_v13, %v4177_v37 }
 0x137   :  { %v443_v58 = vrot.slane %v442_v35, 4  ;;  %v430_v52 = vadd.f32 %v429_v48, %v428_v55  ;;  %v437_v53 = vadd.f32 %v436_v32, %v435_v47 }
 0x138   :  { %636 = vxpose.xlu1.b32.end [2/2] (short) (narrow) %v468_v14, 56 }
 0x139   :  { %v444_v39 = vadd.f32 %v443_v58, %v442_v35  ;;  %3727 = vrcp.f32 %v430_v52  ;;  %v438_v59 = vrot.slane %v437_v53, 1 }
 0x13a   :  { %v3724_v63 = vpop.eup %3723 }
 0x13b   :  { %v471_v61 = vmul.f32 %v3724_v63, %v4185_v49  ;;  %v472_v0 = vmul.f32 %v3724_v63, %v4187_v56  ;;  %v439_v57 = vadd.f32 %v438_v59, %v437_v53  ;;  %v445_v1 = vrot.slane %v444_v39, 2  ;;  %v4349_v63 = vld [vmem:[%s5591_s1 + $0x10] sm:$0xff] }
 0x13d   :  { %3729 = vrcp.f32 %v439_v57  ;;  %v446_v11 = vadd.f32 %v445_v1, %v444_v39  ;;  %v1765_v57 = vsel %vm41_vm0, %v4349_v63, -inf  ;;  %v4362_v1 = vld [vmem:[%s5591_s1 + $0x18] sm:$0xff] }
 0x13e   :  { %v3726_v2 = vpop.eup %3725 }
 0x13f   :  { %v473_v6 = vmul.f32 %v3726_v2, %v4193_v3  ;;  %v474_v37 = vmul.f32 %v3726_v2, %v4195_v5  ;;  %v447_v4 = vrot.slane %v446_v11, 1 }
 0x141   :  { %v448_v10 = vadd.f32 %v447_v4, %v446_v11  ;;  %v4375_v4 = vld [vmem:[%s5591_s1 + $0x20] sm:$0xff] }
 0x143   :  { %v3728_v50 = vpop.eup %3727  ;;  %3731 = vrcp.f32 %v448_v10 }
 0x144   :  { %v475_v46 = vmul.f32 %v3728_v50, %v4203_v60  ;;  %v476_v7 = vmul.f32 %v3728_v50, %v4205_v43 }
 0x147   :  { %v3730_v49 = vpop.eup %3729 }
 0x148   :  { %v477_v33 = vmul.f32 %v3730_v49, %v3710_v42  ;;  %v478_v56 = vmul.f32 %v3730_v49, %v3712_v62  ;;  %v4388_v49 = vld [vmem:[%s5591_s1 + $0x28] sm:$0xff] }
 0x14a   :  { %788 = vxpose.xlu0.b32.start [1/2] (short) (narrow) %v469_v51, 56 }
 0x14d   :  { %v3732_v36 = vpop.eup %3731  ;;  %941 = vxpose.xlu1.b32.start [1/2] (short) (narrow) %v471_v61, 56 }
 0x14e   :  { %789 = vxpose.xlu0.b32.end [2/2] (short) (narrow) %v470_v54, 56  ;;  %v479_v41 = vmul.f32 %v3732_v36, %v3718_v40  ;;  %v480_v14 = vmul.f32 %v3732_v36, %v3720_v45  ;;  %v1771_v36 = vsel %vm41_vm0, %v4388_v49, -inf }
 0x151   :  { %942 = vxpose.xlu1.b32.end [2/2] (short) (narrow) %v472_v0, 56 }
 0x163   :  { %1094 = vxpose.xlu0.b32.start [1/2] (short) (narrow) %v473_v6, 56 }
 0x166   :  { %1247 = vxpose.xlu1.b32.start [1/2] (short) (narrow) %v475_v46, 56 }
 0x167   :  { %1095 = vxpose.xlu0.b32.end [2/2] (short) (narrow) %v474_v37, 56  ;;  %v1767_v37 = vsel %vm41_vm0, %v4362_v1, -inf }
 0x16a   :  { %1248 = vxpose.xlu1.b32.end [2/2] (short) (narrow) %v476_v7, 56  ;;  %v1769_v7 = vsel %vm41_vm0, %v4375_v4, -inf }
 0x17c   :  { %1400 = vxpose.xlu0.b32.start [1/2] (short) (narrow) %v477_v33, 56 }
 0x17f   :  { %1553 = vxpose.xlu1.b32.start [1/2] (short) (narrow) %v479_v41, 56  ;;  %v4401_v41 = vld [vmem:[%s5591_s1 + $0x30] sm:$0x3] }
 0x180   :  { %1401 = vxpose.xlu0.b32.end [2/2] (short) (narrow) %v478_v56, 56 }
 0x183   :  { %1554 = vxpose.xlu1.b32.end [2/2] (short) (narrow) %v480_v14, 56 }
 0x1b1   :  { %v497_v3 = vpop.trf.xlu0 }
 0x1b2   :  { %3441 = vmatmul.mubr.msk.f32.vlgmr.msra.gmra.mrb[0].mxu1 %vm513_vm4, %v497_v3 }
 0x1b3   :  { %3659 = vmatpush3.bf16.msra.mxu1 %v3658_v12  ;;  %3443 = vmatprep.mubr.msk.f32.mxu1 %vm3886_vm3, %v3887_v38 }
 0x1b4   :  { %v651_v5 = vpop.trf.xlu1  ;;  %3663 = vmatprep.subr.bf16.mxu1 %v3885_v31 }
 0x1b5   :  { %v498_v60 = vpop.trf.xlu0  ;;  %2598 = vbcast.lane.b32.xlu1 %v3302_v8, 264 }
 0x1b6   :  { %3444 = vmatmul.mubr.msk.f32.gmra.mrb[2].mxu1 %vm513_vm4, %v498_v60  ;;  %v1774_v60 = vsel %vm1773_vm5, %v4401_v41, -inf }
 0x1b7   :  { %3446 = vmatprep.mubr.msk.f32.mxu1 %vm3886_vm3, %v3887_v38 }
 0x1b8   :  { %v652_v43 = vpop.trf.xlu1 }
 0x1b9   :  { %v499_v42 = vpop.trf.xlu0  ;;  %2602 = vbcast.lane.b32.xlu1 %v3302_v8, 272 }
 0x1ba   :  { %3447 = vmatmul.mubr.msk.f32.gmra.mrb[4].mxu1 %vm513_vm4, %v499_v42  ;;  %v4427_v42 = vld [vmem:[%s5591_s1 + $0x70] sm:$0xff] }
 0x1bb   :  { %3449 = vmatprep.mubr.msk.f32.mxu1 %vm3886_vm3, %v3887_v38 }
 0x1bc   :  { %v653_v9 = vpop.trf.xlu1 }
 0x1bd   :  { %v500_v12 = vpop.trf.xlu0  ;;  %2594 = vbcast.lane.b32.xlu0 %v3302_v8, 256  ;;  %2610 = vbcast.lane.b32.xlu1 %v3302_v8, 288 }
 0x1be   :  { %3450 = vmatmul.mubr.msk.f32.gmra.mrb[6].mxu1 %vm513_vm4, %v500_v12 }
 0x1bf   :  { %3452 = vmatprep.mubr.msk.f32.mxu1 %vm3886_vm3, %v3887_v38 }
 0x1c0   :  { %v654_v62 = vpop.trf.xlu1 }
 0x1c1   :  { %v501_v40 = vpop.trf.xlu0  ;;  %2606 = vbcast.lane.b32.xlu0 %v3302_v8, 280  ;;  %2618 = vbcast.lane.b32.xlu1 %v3302_v8, 304 }
 0x1c2   :  { %3453 = vmatmul.mubr.msk.f32.gmra.mrb[8].mxu1 %vm513_vm4, %v501_v40 }
 0x1c3   :  { %3455 = vmatprep.mubr.msk.f32.mxu1 %vm3886_vm3, %v3887_v38 }
 0x1c4   :  { %v655_v16 = vpop.trf.xlu1 }
 0x1c5   :  { %v502_v45 = vpop.trf.xlu0  ;;  %2614 = vbcast.lane.b32.xlu0 %v3302_v8, 296  ;;  %v4432_v8 = vld [vmem:[%s5591_s1 + $0x78] sm:$0xff] }
 0x1c6   :  { %3456 = vmatmul.mubr.msk.f32.gmra.mrb[10].mxu1 %vm513_vm4, %v502_v45  ;;  %v1802_v40 = vsel %vm41_vm0, %v4432_v8, -inf  ;;  %v4447_v45 = vld [vmem:[%s5591_s1 + $0x80] sm:$0xff] }
 0x1c7   :  { %3458 = vmatprep.mubr.msk.f32.mxu1 %vm3886_vm3, %v3887_v38 }
 0x1c8   :  { %v656_v47 = vpop.trf.xlu1 }
 0x1c9   :  { %v503_v44 = vpop.trf.xlu0 }
 0x1ca   :  { %3459 = vmatmul.mubr.msk.f32.gmra.mrb[12].mxu1 %vm513_vm4, %v503_v44 }
 0x1cb   :  { %3465 = vmatprep.mubr.msk.f32.mxu1 %vm3886_vm3, %v3887_v38 }
 0x1cc   :  { %v657_v55 = vpop.trf.xlu1 }
 0x1cd   :  { %v804_v34 = vpop.trf.xlu0 }
 0x1ce   :  { %3466 = vmatmul.mubr.msk.f32.vlgmr.msra.gmra.mrb[14].mxu1 %vm513_vm4, %v651_v5  ;;  %3491 = vmatmul.mubr.msk.f32.vlgmr.msra.gmra.mrb[16].mxu0 %vm513_vm4, %v804_v34 }
 0x1cf   :  { %3668 = vmatpush3.bf16.msra.mxu0 %v3667_v21  ;;  %3665 = vmatpush3.bf16.msra.mxu1 %v3664_v20 }
 0x1d0   :  { %3468 = vmatprep.mubr.msk.f32.mxu1 %vm3886_vm3, %v3887_v38  ;;  %3493 = vmatprep.mubr.msk.f32.mxu0 %vm3886_vm3, %v3887_v38  ;;  %v957_v13 = vpop.trf.xlu1 }
 0x1d1   :  { %v805_v35 = vpop.trf.xlu0  ;;  %3672 = vmatprep.subr.bf16.mxu0 %v3885_v31  ;;  %3669 = vmatprep.subr.bf16.mxu1 %v3885_v31 }
 0x1d2   :  { %3469 = vmatmul.mubr.msk.f32.gmra.mrb[16].mxu1 %vm513_vm4, %v652_v43  ;;  %3494 = vmatmul.mubr.msk.f32.gmra.mrb[18].mxu0 %vm513_vm4, %v805_v35 }
 0x1d3   :  { %3471 = vmatprep.mubr.msk.f32.mxu1 %vm3886_vm3, %v3887_v38  ;;  %3496 = vmatprep.mubr.msk.f32.mxu0 %vm3886_vm3, %v3887_v38 }
 0x1d4   :  { %v958_v15 = vpop.trf.xlu1 }
 0x1d5   :  { %v806_v17 = vpop.trf.xlu0 }
 0x1d6   :  { %3472 = vmatmul.mubr.msk.f32.gmra.mrb[18].mxu1 %vm513_vm4, %v653_v9  ;;  %3497 = vmatmul.mubr.msk.f32.gmra.mrb[20].mxu0 %vm513_vm4, %v806_v17 }
 0x1d7   :  { %3474 = vmatprep.mubr.msk.f32.mxu1 %vm3886_vm3, %v3887_v38  ;;  %3499 = vmatprep.mubr.msk.f32.mxu0 %vm3886_vm3, %v3887_v38 }
 0x1d8   :  { %v959_v18 = vpop.trf.xlu1 }
 0x1d9   :  { %v807_v19 = vpop.trf.xlu0 }
 0x1da   :  { %3475 = vmatmul.mubr.msk.f32.gmra.mrb[20].mxu1 %vm513_vm4, %v654_v62  ;;  %3500 = vmatmul.mubr.msk.f32.gmra.mrb[22].mxu0 %vm513_vm4, %v807_v19  ;;  %v1801_v62 = vsel %vm41_vm0, %v4427_v42, -inf  ;;  %v4476_v19 = vld [vmem:[%s5591_s1 + $0x40] sm:$0xff] }
 0x1db   :  { %3477 = vmatprep.mubr.msk.f32.mxu1 %vm3886_vm3, %v3887_v38  ;;  %3502 = vmatprep.mubr.msk.f32.mxu0 %vm3886_vm3, %v3887_v38  ;;  %v1803_v44 = vmax.f32 %v1801_v62, %v1802_v40 }
 0x1dc   :  { %v960_v20 = vpop.trf.xlu1 }
 0x1dd   :  { %v808_v21 = vpop.trf.xlu0 }
 0x1de   :  { %3478 = vmatmul.mubr.msk.f32.gmra.mrb[22].mxu1 %vm513_vm4, %v655_v16  ;;  %3503 = vmatmul.mubr.msk.f32.gmra.mrb[24].mxu0 %vm513_vm4, %v808_v21 }
 0x1df   :  { %3480 = vmatprep.mubr.msk.f32.mxu1 %vm3886_vm3, %v3887_v38  ;;  %3505 = vmatprep.mubr.msk.f32.mxu0 %vm3886_vm3, %v3887_v38 }
 0x1e0   :  { %v961_v48 = vpop.trf.xlu1 }
 0x1e1   :  { %v809_v32 = vpop.trf.xlu0 }
 0x1e2   :  { %3481 = vmatmul.mubr.msk.f32.gmra.mrb[24].mxu1 %vm513_vm4, %v656_v47  ;;  %3506 = vmatmul.mubr.msk.f32.gmra.mrb[26].mxu0 %vm513_vm4, %v809_v32 }
 0x1e3   :  { %3483 = vmatprep.mubr.msk.f32.mxu1 %vm3886_vm3, %v3887_v38  ;;  %3508 = vmatprep.mubr.msk.f32.mxu0 %vm3886_vm3, %v3887_v38 }
 0x1e4   :  { %v962_v51 = vpop.trf.xlu1 }
 0x1e5   :  { %v810_v54 = vpop.trf.xlu0 }
 0x1e6   :  { %3484 = vmatmul.mubr.msk.f32.gmra.mrb[26].mxu1 %vm513_vm4, %v657_v55  ;;  %3509 = vmatmul.mubr.msk.f32.gmra.mrb[28].mxu0 %vm513_vm4, %v810_v54  ;;  %v1804_v55 = vsel %vm41_vm0, %v4447_v45, -inf  ;;  %v1783_v54 = vsel %vm41_vm0, %v4476_v19, -inf }
 0x1e7   :  { %3515 = vmatprep.mubr.msk.f32.mxu1 %vm3886_vm3, %v3887_v38  ;;  %3540 = vmatprep.mubr.msk.f32.mxu0 %vm3886_vm3, %v3887_v38  ;;  %v1805_v17 = vmax.f32 %v1803_v44, %v1804_v55 }
 0x1e8   :  { %v963_v58 = vpop.trf.xlu1 }
 0x1e9   :  { %v1110_v52 = vpop.trf.xlu0 }
 0x1ea   :  { %3516 = vmatmul.mubr.msk.f32.vlgmr.msra.gmra.mrb[28].mxu1 %vm513_vm4, %v957_v13  ;;  %3541 = vmatmul.mubr.msk.f32.vlgmr.msra.gmra.mrb[30].mxu0 %vm513_vm4, %v1110_v52  ;;  %v4460_v13 = vld [vmem:[%s5591_s1 + $0x88] sm:$0xff] }
 0x1eb   :  { %3674 = vmatpush3.bf16.msra.mxu0 %v3673_v29  ;;  %3671 = vmatpush3.bf16.msra.mxu1 %v3670_v25  ;;  %v4334_v25 = vld [vmem:[%s5591_s1 + $0x8] sm:$0xff] }
 0x1ec   :  { %3518 = vmatprep.mubr.msk.f32.mxu1 %vm3886_vm3, %v3887_v38  ;;  %3543 = vmatprep.mubr.msk.f32.mxu0 %vm3886_vm3, %v3887_v38  ;;  %v1263_v53 = vpop.trf.xlu1  ;;  %v1763_v59 = vsel %vm41_vm0, %v4334_v25, -inf }
 0x1ed   :  { %v1111_v39 = vpop.trf.xlu0  ;;  %3675 = vmatprep.subr.bf16.mxu1 %v3885_v31  ;;  %v1762_v31 = vsel %vm41_vm0, %v4329_v24, -inf }
 0x1ee   :  { %3519 = vmatmul.mubr.msk.f32.gmra.mrb[30].mxu1 %vm513_vm4, %v958_v15  ;;  %3544 = vmatmul.mubr.msk.f32.gmra.mrb[32].mxu0 %vm513_vm4, %v1111_v39  ;;  %v1764_v61 = vmax.f32 %v1762_v31, %v1763_v59  ;;  %v4513_v59 = vld [vmem:[%s5591_s1 + $0x50] sm:$0xff] }
 0x1ef   :  { %3521 = vmatprep.mubr.msk.f32.mxu1 %vm3886_vm3, %v3887_v38  ;;  %3546 = vmatprep.mubr.msk.f32.mxu0 %vm3886_vm3, %v3887_v38 }
 0x1f0   :  { %v1264_v22 = vpop.trf.xlu1  ;;  %v1766_v2 = vmax.f32 %v1764_v61, %v1765_v57  ;;  %v4522_v57 = vld [vmem:[%s5591_s1 + $0xa0] sm:$0x3] }
 0x1f1   :  { %v1112_v23 = vpop.trf.xlu0 }
 0x1f2   :  { %3522 = vmatmul.mubr.msk.f32.gmra.mrb[32].mxu1 %vm513_vm4, %v959_v18  ;;  %3547 = vmatmul.mubr.msk.f32.gmra.mrb[34].mxu0 %vm513_vm4, %v1112_v23  ;;  %v1768_v10 = vmax.f32 %v1766_v2, %v1767_v37  ;;  %v4471_v18 = vld [vmem:[%s5591_s1 + $0x38] sm:$0xff] }
 0x1f3   :  { %3524 = vmatprep.mubr.msk.f32.mxu1 %vm3886_vm3, %v3887_v38  ;;  %3549 = vmatprep.mubr.msk.f32.mxu0 %vm3886_vm3, %v3887_v38  ;;  %v4503_v23 = vld [vmem:[%s5591_s1 + $0x98] sm:$0xff] }
 0x1f4   :  { %v1265_v29 = vpop.trf.xlu1  ;;  %v1770_v33 = vmax.f32 %v1768_v10, %v1769_v7  ;;  %v1810_v61 = vsel %vm41_vm0, %v4503_v23, -inf  ;;  %v4532_v10 = vld [vmem:[%s5591_s1 + $0x58] sm:$0xff] }
 0x1f5   :  { %v1113_v26 = vpop.trf.xlu0 }
 0x1f6   :  { %3525 = vmatmul.mubr.msk.f32.gmra.mrb[34].mxu1 %vm513_vm4, %v960_v20  ;;  %3550 = vmatmul.mubr.msk.f32.gmra.mrb[36].mxu0 %vm513_vm4, %v1113_v26  ;;  %v1772_v3 = vmax.f32 %v1770_v33, %v1771_v36  ;;  %v1806_v20 = vsel %vm41_vm0, %v4460_v13, -inf }
 0x1f7   :  { %3527 = vmatprep.mubr.msk.f32.mxu1 %vm3886_vm3, %v3887_v38  ;;  %3552 = vmatprep.mubr.msk.f32.mxu0 %vm3886_vm3, %v3887_v38 }
 0x1f8   :  { %v1266_v11 = vpop.trf.xlu1  ;;  %v1775_v27 = vmax.f32 %v1772_v3, %v1774_v60  ;;  %v4548_v3 = vld [vmem:[%s5591_s1 + $0x60] sm:$0xff] }
 0x1f9   :  { %v1114_v0 = vpop.trf.xlu0 }
 0x1fa   :  { %3528 = vmatmul.mubr.msk.f32.gmra.mrb[36].mxu1 %vm513_vm4, %v961_v48  ;;  %3553 = vmatmul.mubr.msk.f32.gmra.mrb[38].mxu0 %vm513_vm4, %v1114_v0  ;;  %v1776_v43 = vrot.slane %v1775_v27, 4  ;;  %v4483_v48 = vld [vmem:[%s5591_s1 + $0x90] sm:$0xff] }
 0x1fb   :  { %3530 = vmatprep.mubr.msk.f32.mxu1 %vm3886_vm3, %v3887_v38  ;;  %3555 = vmatprep.mubr.msk.f32.mxu0 %vm3886_vm3, %v3887_v38  ;;  %v1808_v39 = vsel %vm41_vm0, %v4483_v48, -inf }
 0x1fc   :  { %v1267_v46 = vpop.trf.xlu1  ;;  %v1777_v16 = vmax.f32 %v1775_v27, %v1776_v43  ;;  %v1791_v27 = vsel %vm41_vm0, %v4548_v3, -inf  ;;  %v4563_v43 = vld [vmem:[%s5591_s1 + $0xe8] sm:$0xff] }
 0x1fd   :  { %v1115_v6 = vpop.trf.xlu0 }
 0x1fe   :  { %3531 = vmatmul.mubr.msk.f32.gmra.mrb[38].mxu1 %vm513_vm4, %v962_v51  ;;  %3556 = vmatmul.mubr.msk.f32.gmra.mrb[40].mxu0 %vm513_vm4, %v1115_v6  ;;  %v1778_v34 = vrot.slane %v1777_v16, 2  ;;  %v1782_v51 = vsel %vm41_vm0, %v4471_v18, -inf  ;;  %v1787_v6 = vsel %vm41_vm0, %v4513_v59, -inf }
 0x1ff   :  { %3533 = vmatprep.mubr.msk.f32.mxu1 %vm3886_vm3, %v3887_v38  ;;  %3558 = vmatprep.mubr.msk.f32.mxu0 %vm3886_vm3, %v3887_v38  ;;  %v1784_v26 = vmax.f32 %v1782_v51, %v1783_v54 }
 0x200   :  { %v1268_v14 = vpop.trf.xlu1  ;;  %v1779_v21 = vmax.f32 %v1777_v16, %v1778_v34 }
 0x201   :  { %v1116_v50 = vpop.trf.xlu0 }
 0x202   :  { %3534 = vmatmul.mubr.msk.f32.gmra.mrb[40].mxu1 %vm513_vm4, %v963_v58  ;;  %3559 = vmatmul.mubr.msk.f32.gmra.mrb[42].mxu0 %vm513_vm4, %v1116_v50  ;;  %v1807_v58 = vmax.f32 %v1805_v17, %v1806_v20  ;;  %v1812_v50 = vsel %vm1773_vm5, %v4522_v57, -inf }
 0x203   :  { %3565 = vmatprep.mubr.msk.f32.mxu1 %vm3886_vm3, %v3887_v38  ;;  %3590 = vmatprep.mubr.msk.f32.mxu0 %vm3886_vm3, %v3887_v38 }
 0x204   :  { %v1809_v31 = vmax.f32 %v1807_v58, %v1808_v39 }
 0x205   :  { %v1416_v56 = vpop.trf.xlu0 }
 0x206   :  { %3566 = vmatmul.mubr.msk.f32.vlgmr.msra.gmra.mrb[42].mxu1 %vm513_vm4, %v1263_v53  ;;  %3591 = vmatmul.mubr.msk.f32.vlgmr.msra.gmra.mrb[44].mxu0 %vm513_vm4, %v1416_v56  ;;  %v4496_v53 = vld [vmem:[%s5591_s1 + $0x48] sm:$0xff]  ;;  %v1811_v37 = vmax.f32 %v1809_v31, %v1810_v61  ;;  %v1789_v56 = vsel %vm41_vm0, %v4532_v10, -inf  ;;  %v4622_v61 = vld [vmem:[%s5591_s1 + $0xb0] sm:$0xff] }
 0x207   :  { %3677 = vmatpush3.bf16.msra.mxu1 %v3676_v30  ;;  %3568 = vmatprep.mubr.msk.f32.mxu1 %vm3886_vm3, %v3887_v38  ;;  %v1269_v30 = vpop.trf.xlu1  ;;  %v4617_v31 = vld [vmem:[%s5591_s1 + $0xa8] sm:$0xff] }
 0x208   :  { %3593 = vmatprep.mubr.msk.f32.mxu0 %vm3886_vm3, %v3887_v38  ;;  %v1813_v36 = vmax.f32 %v1811_v37, %v1812_v50 }
 0x209   :  { %v1417_v5 = vpop.trf.xlu0 }
 0x20a   :  { %3569 = vmatmul.mubr.msk.f32.gmra.mrb[44].mxu1 %vm513_vm4, %v1264_v22  ;;  %3594 = vmatmul.mubr.msk.f32.gmra.mrb[46].mxu0 %vm513_vm4, %v1417_v5  ;;  %v1780_v22 = vrot.slane %v1779_v21, 1 }
 0x20b   :  { %3571 = vmatprep.mubr.msk.f32.mxu1 %vm3886_vm3, %v3887_v38  ;;  %3596 = vmatprep.mubr.msk.f32.mxu0 %vm3886_vm3, %v3887_v38  ;;  %v1569_v12 = vpop.trf.xlu1 }
 0x20c   :  { %v4517_v0 = vmax.f32 %v1779_v21, %v1780_v22 }
 0x20d   :  { %v1418_v28 = vpop.trf.xlu0 }
 0x20e   :  { %3572 = vmatmul.mubr.msk.f32.gmra.mrb[46].mxu1 %vm513_vm4, %v1265_v29  ;;  %3597 = vmatmul.mubr.msk.f32.gmra.mrb[48].mxu0 %vm513_vm4, %v1418_v28  ;;  %v1785_v29 = vsel %vm41_vm0, %v4496_v53, -inf  ;;  %v1916_v7 = vsub.f32 %v4334_v25, %v4517_v0  ;;  %v1814_v28 = vrot.slane %v1813_v36, 4  ;;  %v1919_v34 = vsub.f32 %v4375_v4, %v4517_v0 }
 0x20f   :  { %3574 = vmatprep.mubr.msk.f32.mxu1 %vm3886_vm3, %v3887_v38  ;;  %3599 = vmatprep.mubr.msk.f32.mxu0 %vm3886_vm3, %v3887_v38  ;;  %v1570_v15 = vpop.trf.xlu1  ;;  %v1786_v2 = vmax.f32 %v1784_v26, %v1785_v29  ;;  %v1920_v4 = vsub.f32 %v4388_v49, %v4517_v0 }
 0x210   :  { %v1973_v5 = vmul.f32 1.442695, %v1916_v7  ;;  %v1815_v55 = vmax.f32 %v1813_v36, %v1814_v28  ;;  %v1979_v58 = vmul.f32 1.442695, %v1919_v34  ;;  %v4646_v36 = vld [vmem:[%s5591_s1 + $0xb8] sm:$0xff] }
 0x211   :  { %v1419_v9 = vpop.trf.xlu0  ;;  %v1788_v33 = vmax.f32 %v1786_v2, %v1787_v6  ;;  %v1981_v49 = vmul.f32 1.442695, %v1920_v4  ;;  %v1921_v2 = vsub.f32 %v4401_v41, %v4517_v0  ;;  %v1820_v41 = vsel %vm41_vm0, %v4617_v31, -inf  ;;  %v4683_v4 = vld [vmem:[%s5591_s1 + $0xc8] sm:$0xff] }
 0x212   :  { %3575 = vmatmul.mubr.msk.f32.gmra.mrb[48].mxu1 %vm513_vm4, %v1266_v11  ;;  %3600 = vmatmul.mubr.msk.f32.gmra.mrb[50].mxu0 %vm513_vm4, %v1419_v9  ;;  %v1918_v9 = vsub.f32 %v4362_v1, %v4517_v0  ;;  %v4584_v1 = vld [vmem:[%s5591_s1 + $0xf0] sm:$0xff]  ;;  %v1816_v21 = vrot.slane %v1815_v55, 2 }
 0x213   :  { %3577 = vmatprep.mubr.msk.f32.mxu1 %vm3886_vm3, %v3887_v38  ;;  %3602 = vmatprep.mubr.msk.f32.mxu0 %vm3886_vm3, %v3887_v38  ;;  %v1571_v52 = vpop.trf.xlu1  ;;  %v1790_v60 = vmax.f32 %v1788_v33, %v1789_v56  ;;  %v1842_v20 = vsel %vm41_vm0, %v4584_v1, -inf  ;;  %v4635_v33 = vld [vmem:[%s5591_s1 + $0x108] sm:$0xff] }
 0x214   :  { %v1817_v26 = vmax.f32 %v1815_v55, %v1816_v21 }
 0x215   :  { %v1420_v47 = vpop.trf.xlu0  ;;  %v1792_v40 = vmax.f32 %v1790_v60, %v1791_v27  ;;  %v1848_v60 = vsel %vm41_vm0, %v4635_v33, -inf }
 0x216   :  { %3578 = vmatmul.mubr.msk.f32.gmra.mrb[50].mxu1 %vm513_vm4, %v1267_v46  ;;  %3603 = vmatmul.mubr.msk.f32.gmra.mrb[52].mxu0 %vm513_vm4, %v1420_v47  ;;  %v1915_v46 = vsub.f32 %v4329_v24, %v4517_v0  ;;  %v1917_v24 = vsub.f32 %v4349_v63, %v4517_v0  ;;  %v4570_v63 = vld [vmem:[%s5591_s1 + $0x68] sm:$0x3]  ;;  %v1840_v47 = vsel %vm41_vm0, %v4563_v43, -inf  ;;  %v1818_v7 = vrot.slane %v1817_v26, 1 }
 0x217   :  { %3580 = vmatprep.mubr.msk.f32.mxu1 %vm3886_vm3, %v3887_v38  ;;  %3605 = vmatprep.mubr.msk.f32.mxu0 %vm3886_vm3, %v3887_v38  ;;  %v1572_v11 = vpop.trf.xlu1  ;;  %v1793_v44 = vsel %vm1773_vm5, %v4570_v63, -inf  ;;  %v1821_v0 = vsel %vm41_vm0, %v4622_v61, -inf }
 0x218   :  { %v1971_v25 = vmul.f32 1.442695, %v1915_v46  ;;  %v1794_v17 = vmax.f32 %v1792_v40, %v1793_v44  ;;  %v4652_v28 = vmax.f32 %v1817_v26, %v1818_v7  ;;  %v1823_v40 = vsel %vm41_vm0, %v4646_v36, -inf }
 0x219   :  { %v1421_v35 = vpop.trf.xlu0 }
 0x21a   :  { %3581 = vmatmul.mubr.msk.f32.gmra.mrb[52].mxu1 %vm513_vm4, %v1268_v14  ;;  %3606 = vmatmul.mubr.msk.f32.gmra.mrb[54].mxu0 %vm513_vm4, %v1421_v35  ;;  %3733 = vpow2.f32 %v1971_v25  ;;  %v1930_v21 = vsub.f32 %v4432_v8, %v4652_v28  ;;  %v4692_v8 = vld [vmem:[%s5591_s1 + $0x150] sm:$0xff] }
 0x21b   :  { %3583 = vmatprep.mubr.msk.f32.mxu1 %vm3886_vm3, %v3887_v38  ;;  %3608 = vmatprep.mubr.msk.f32.mxu0 %vm3886_vm3, %v3887_v38  ;;  %v1573_v14 = vpop.trf.xlu1  ;;  %3735 = vpow2.f32 %v1973_v5 }
 0x21d   :  { %v1422_v32 = vpop.trf.xlu0 }
 0x21e   :  { %3584 = vmatmul.mubr.msk.f32.gmra.mrb[54].mxu1 %vm513_vm4, %v1269_v30  ;;  %3609 = vmatmul.mubr.msk.f32.gmra.mrb[56].mxu0 %vm513_vm4, %v1422_v32  ;;  %v4558_v30 = vld [vmem:[%s5591_s1 + $0xe0] sm:$0xff]  ;;  %v4596_v32 = vld [vmem:[%s5591_s1 + $0xf8] sm:$0xff] }
 0x21f   :  { %3615 = vmatprep.mubr.msk.f32.mxu1 %vm3886_vm3, %v3887_v38  ;;  %v1574_v62 = vpop.trf.xlu1  ;;  %v1839_v16 = vsel %vm41_vm0, %v4558_v30, -inf  ;;  %v1844_v39 = vsel %vm41_vm0, %v4596_v32, -inf }
 0x220   :  { %v1841_v35 = vmax.f32 %v1839_v16, %v1840_v47  ;;  %v4666_v16 = vld [vmem:[%s5591_s1 + $0xc0] sm:$0xff] }
 0x222   :  { %3616 = vmatmul.mubr.msk.f32.vlgmr.msra.gmra.mrb[56].mxu1 %vm513_vm4, %v1569_v12  ;;  %v1975_v12 = vmul.f32 1.442695, %v1917_v24  ;;  %v1843_v54 = vmax.f32 %v1841_v35, %v1842_v20  ;;  %v1983_v24 = vmul.f32 1.442695, %v1921_v2  ;;  %v1931_v2 = vsub.f32 %v4447_v45, %v4652_v28 }
 0x223   :  { %3618 = vmatprep.mubr.msk.f32.mxu1 %vm3886_vm3, %v3887_v38  ;;  %v1575_v51 = vpop.trf.xlu1 }
 0x224   :  { %3737 = vpow2.f32 %v1975_v12  ;;  %v4604_v22 = vpop.eup %3733  ;;  %v4657_v12 = vld [vmem:[%s5591_s1 + $0x110] sm:$0x3] }
 0x225   :  { %v4612_v29 = vpop.eup %3735  ;;  %v2083_v50 = vsel %vm41_vm0, %v4604_v22, 0.0  ;;  %v1850_v34 = vsel %vm1773_vm5, %v4657_v12, -inf }
 0x226   :  { %3619 = vmatmul.mubr.msk.f32.gmra.mrb[58].mxu1 %vm513_vm4, %v1570_v15  ;;  %v1977_v15 = vmul.f32 1.442695, %v1918_v9  ;;  %v2084_v46 = vsel %vm41_vm0, %v4612_v29, 0.0  ;;  %v1822_v9 = vmax.f32 %v1820_v41, %v1821_v0  ;;  %v1877_v0 = vsel %vm41_vm0, %v4692_v8, -inf }
 0x227   :  { %3621 = vmatprep.mubr.msk.f32.mxu1 %vm3886_vm3, %v3887_v38  ;;  %v2085_v25 = vadd.f32 %v2084_v46, %v2083_v50  ;;  %v4706_v50 = vld [vmem:[%s5591_s1 + $0xd0] sm:$0xff] }
 0x228   :  { %3739 = vpow2.f32 %v1977_v15  ;;  %v1929_v15 = vsub.f32 %v4427_v42, %v4652_v28 }
 0x229   :  { %3741 = vpow2.f32 %v1979_v58 }
 0x22a   :  { %3622 = vmatmul.mubr.msk.f32.gmra.mrb[60].mxu1 %vm513_vm4, %v1571_v52  ;;  %v1795_v52 = vrot.slane %v1794_v17, 4  ;;  %3743 = vpow2.f32 %v1981_v49  ;;  %v1999_v26 = vmul.f32 1.442695, %v1929_v15 }
 0x22b   :  { %3624 = vmatprep.mubr.msk.f32.mxu1 %vm3886_vm3, %v3887_v38  ;;  %3745 = vpow2.f32 %v1983_v24 }
 0x22c   :  { %v1796_v6 = vmax.f32 %v1794_v17, %v1795_v52  ;;  %v1824_v17 = vmax.f32 %v1822_v9, %v1823_v40  ;;  %3747 = vpow2.f32 %v1999_v26  ;;  %v1829_v9 = vsel %vm41_vm0, %v4706_v50, -inf  ;;  %v4730_v40 = vld [vmem:[%s5591_s1 + $0xd8] sm:$0x3] }
 0x22e   :  { %3625 = vmatmul.mubr.msk.f32.gmra.mrb[62].mxu1 %vm513_vm4, %v1572_v11  ;;  %v1845_v11 = vmax.f32 %v1843_v54, %v1844_v39  ;;  %v4637_v56 = vpop.eup %3737  ;;  %v1797_v5 = vrot.slane %v1796_v6, 2 }
 0x22f   :  { %3627 = vmatprep.mubr.msk.f32.mxu1 %vm3886_vm3, %v3887_v38  ;;  %v2086_v27 = vsel %vm41_vm0, %v4637_v56, 0.0 }
 0x230   :  { %v2087_v44 = vadd.f32 %v2086_v27, %v2085_v25  ;;  %v1798_v55 = vmax.f32 %v1796_v6, %v1797_v5  ;;  %v2001_v6 = vmul.f32 1.442695, %v1930_v21  ;;  %v4719_v25 = vld [vmem:[%s5591_s1 + $0x160] sm:$0xff]  ;;  %v2003_v27 = vmul.f32 1.442695, %v1931_v2  ;;  %v4743_v21 = vld [vmem:[%s5591_s1 + $0x168] sm:$0xff] }
 0x232   :  { %3628 = vmatmul.mubr.msk.f32.gmra.mrb[64].mxu1 %vm513_vm4, %v1573_v14  ;;  %v1799_v52 = vrot.slane %v1798_v55, 1  ;;  %3749 = vpow2.f32 %v2001_v6 }
 0x233   :  { %3630 = vmatprep.mubr.msk.f32.mxu1 %vm3886_vm3, %v3887_v38  ;;  %3751 = vpow2.f32 %v2003_v27 }
 0x234   :  { %v4708_v41 = vmax.f32 %v1798_v55, %v1799_v52 }
 0x236   :  { %3631 = vmatmul.mubr.msk.f32.gmra.mrb[66].mxu1 %vm513_vm4, %v1574_v62  ;;  %v4659_v62 = vpop.eup %3739  ;;  %v1923_v15 = vsub.f32 %v4476_v19, %v4708_v41  ;;  %v1882_v19 = vsel %vm41_vm0, %v4743_v21, -inf }
 0x237   :  { %3633 = vmatprep.mubr.msk.f32.mxu1 %vm3886_vm3, %v3887_v38  ;;  %v4610_v38 = vld [vmem:[%s5591_s1 + $0x100] sm:$0xff]  ;;  %v2088_v35 = vsel %vm41_vm0, %v4659_v62, 0.0  ;;  %v4674_v20 = vpop.eup %3741  ;;  %vm3205_vm3 = vcmask 1047559  }
 0x238   :  { %v1846_v37 = vsel %vm41_vm0, %v4610_v38, -inf  ;;  %v2089_v58 = vadd.f32 %v2088_v35, %v2087_v44  ;;  %v4685_v39 = vpop.eup %3743  ;;  %v2090_v42 = vsel %vm41_vm0, %v4674_v20, 0.0  ;;  %v1880_v35 = vsel %vm41_vm0, %v4719_v25, -inf }
 0x239   :  { %v1847_v14 = vmax.f32 %v1845_v11, %v1846_v37  ;;  %v4697_v11 = vld [vmem:[%s5591_s1 + $0x158] sm:$0xff]  ;;  %v1827_v37 = vsel %vm41_vm0, %v4683_v4, -inf  ;;  %v2092_v45 = vsel %vm41_vm0, %v4685_v39, 0.0  ;;  %v4721_v5 = vpop.eup %3745  ;;  %v1987_v2 = vmul.f32 1.442695, %v1923_v15 }
 0x23a   :  { %3634 = vmatmul.mubr.msk.f32.gmra.mrb[68].mxu1 %vm513_vm4, %v1575_v51  ;;  %v1825_v51 = vsel %vm41_vm0, %v4666_v16, -inf  ;;  %v2091_v7 = vadd.f32 %v2090_v42, %v2089_v58 }
 0x23b   :  { %v1849_v47 = vmax.f32 %v1847_v14, %v1848_v60  ;;  %v1826_v49 = vmax.f32 %v1824_v17, %v1825_v51  ;;  %v1878_v14 = vsel %vm41_vm0, %v4697_v11, -inf  ;;  %v1932_v60 = vsub.f32 %v4460_v13, %v4652_v28 }
 0x23c   :  { %v1879_v44 = vmax.f32 %v1877_v0, %v1878_v14  ;;  %v2093_v55 = vadd.f32 %v2092_v45, %v2091_v7  ;;  %v2094_v13 = vsel %vm1773_vm5, %v4721_v5, 0.0  ;;  %v1933_v51 = vsub.f32 %v4483_v48, %v4652_v28  ;;  %v4756_v48 = vld [vmem:[%s5591_s1 + $0x170] sm:$0xff]  ;;  %v4760_v7 = vpop.eup %3747 }
 0x23d   :  { %v1851_v54 = vmax.f32 %v1849_v47, %v1850_v34  ;;  %v1828_v24 = vmax.f32 %v1826_v49, %v1827_v37  ;;  %v1922_v34 = vsub.f32 %v4471_v18, %v4708_v41  ;;  %v2005_v18 = vmul.f32 1.442695, %v1932_v60  ;;  %v4762_v45 = vpop.eup %3749 }
 0x23e   :  { %v1881_v52 = vmax.f32 %v1879_v44, %v1880_v35  ;;  %v2095_v42 = vadd.f32 %v2094_v13, %v2093_v55  ;;  %v1924_v49 = vsub.f32 %v4496_v53, %v4708_v41  ;;  %v1934_v37 = vsub.f32 %v4503_v23, %v4652_v28  ;;  %v4771_v23 = vld [vmem:[%s5591_s1 + $0x118] sm:$0xff] }
 0x23f   :  { %v1852_v46 = vrot.slane %v1851_v54, 4  ;;  %v1830_v17 = vmax.f32 %v1828_v24, %v1829_v9  ;;  %v1985_v26 = vmul.f32 1.442695, %v1922_v34  ;;  %3753 = vpow2.f32 %v2005_v18  ;;  %v4781_v44 = vld [vmem:[%s5591_s1 + $0x178] sm:$0xff] }
 0x240   :  { %v1883_v14 = vmax.f32 %v1881_v52, %v1882_v19  ;;  %v2096_v24 = vrot.slane %v2095_v42, 4  ;;  %v1884_v53 = vsel %vm41_vm0, %v4756_v48, -inf  ;;  %v1925_v60 = vsub.f32 %v4513_v59, %v4708_v41 }
 0x241   :  { %v1853_v47 = vmax.f32 %v1851_v54, %v1852_v46  ;;  %v1831_v54 = vsel %vm1773_vm5, %v4730_v40, -inf  ;;  %v2007_v46 = vmul.f32 1.442695, %v1933_v51  ;;  %3755 = vpow2.f32 %v1985_v26  ;;  %v4802_v26 = vld [vmem:[%s5591_s1 + $0x128] sm:$0xff] }
 0x242   :  { %v1832_v6 = vmax.f32 %v1830_v17, %v1831_v54  ;;  %3757 = vpow2.f32 %v1987_v2  ;;  %v1989_v27 = vmul.f32 1.442695, %v1924_v49  ;;  %v1935_v59 = vsub.f32 %v4522_v57, %v4652_v28  ;;  %v4789_v17 = vpop.eup %3751 }
 0x243   :  { %v1854_v58 = vrot.slane %v1853_v47, 2  ;;  %3759 = vpow2.f32 %v2007_v46  ;;  %v2009_v55 = vmul.f32 1.442695, %v1934_v37  ;;  %v2121_v34 = vsel %vm41_vm0, %v4760_v7, 0.0 }
 0x244   :  { %v1833_v9 = vrot.slane %v1832_v6, 4  ;;  %v2122_v35 = vsel %vm41_vm0, %v4762_v45, 0.0  ;;  %v1885_v15 = vmax.f32 %v1883_v14, %v1884_v53  ;;  %v2097_v51 = vadd.f32 %v2096_v24, %v2095_v42  ;;  %v4807_v42 = vld [vmem:[%s5591_s1 + $0x180] sm:$0x3] }
 0x245   :  { %v1855_v0 = vmax.f32 %v1853_v47, %v1854_v58  ;;  %v4776_v47 = vld [vmem:[%s5591_s1 + $0x120] sm:$0xff]  ;;  %v1858_v18 = vsel %vm41_vm0, %v4771_v23, -inf  ;;  %v1886_v57 = vsel %vm41_vm0, %v4781_v44, -inf  ;;  %v1926_v28 = vsub.f32 %v4532_v10, %v4708_v41 }
 0x246   :  { %v1859_v54 = vsel %vm41_vm0, %v4776_v47, -inf  ;;  %3761 = vpow2.f32 %v1989_v27  ;;  %v1991_v58 = vmul.f32 1.442695, %v1925_v60  ;;  %v1834_v52 = vmax.f32 %v1832_v6, %v1833_v9  ;;  %v4822_v9 = vld [vmem:[%s5591_s1 + $0x130] sm:$0xff] }
 0x247   :  { %v1856_v13 = vrot.slane %v1855_v0, 1  ;;  %3763 = vpow2.f32 %v2009_v55  ;;  %v2011_v19 = vmul.f32 1.442695, %v1935_v59  ;;  %v2123_v49 = vadd.f32 %v2122_v35, %v2121_v34 }
 0x248   :  { %v2124_v2 = vsel %vm41_vm0, %v4789_v17, 0.0  ;;  %v1860_v37 = vmax.f32 %v1858_v18, %v1859_v54  ;;  %v1887_v6 = vmax.f32 %v1885_v15, %v1886_v57  ;;  %v1861_v14 = vsel %vm41_vm0, %v4802_v26, -inf }
 0x249   :  { %v4811_v10 = vmax.f32 %v1855_v0, %v1856_v13  ;;  %v4813_v46 = vpop.eup %3753  ;;  %v1888_v24 = vsel %vm1773_vm5, %v4807_v42, -inf  ;;  %v2098_v53 = vrot.slane %v2097_v51, 2  ;;  %3765 = vpow2.f32 %v1991_v58 }
 0x24a   :  { %v1993_v60 = vmul.f32 1.442695, %v1926_v28  ;;  %v1835_v27 = vrot.slane %v1834_v52, 2  ;;  %v1927_v59 = vsub.f32 %v4548_v3, %v4708_v41  ;;  %3767 = vpow2.f32 %v2011_v19 }
 0x24b   :  { %v4824_v0 = vpop.eup %3755  ;;  %v2125_v55 = vadd.f32 %v2124_v2, %v2123_v49  ;;  %v2126_v35 = vsel %vm41_vm0, %v4813_v46, 0.0  ;;  %v1943_v13 = vsub.f32 %v4558_v30, %v4811_v10  ;;  %v1862_v15 = vmax.f32 %v1860_v37, %v1861_v14  ;;  %v4845_v30 = vld [vmem:[%s5591_s1 + $0x138] sm:$0xff] }
 0x24c   :  { %5610 = vst [vmem:[#allocation5_spill] sm:$0xff] %v4824_v0  ;;  %v4828_v34 = vpop.eup %3757  ;;  %v1889_v18 = vmax.f32 %v1887_v6, %v1888_v24  ;;  %v1944_v57 = vsub.f32 %v4563_v43, %v4811_v10  ;;  %v1863_v3 = vsel %vm41_vm0, %v4822_v9, -inf  ;;  %v2099_v28 = vadd.f32 %v2098_v53, %v2097_v51 }
 0x24d   :  { %5611 = vst [vmem:[#allocation6_spill] sm:$0xff] %v4828_v34  ;;  %v4834_v54 = vpop.eup %3759  ;;  %v1928_v58 = vsub.f32 %v4570_v63, %v4708_v41  ;;  %3769 = vpow2.f32 %v1993_v60  ;;  %v1836_v19 = vmax.f32 %v1834_v52, %v1835_v27  ;;  %v1995_v49 = vmul.f32 1.442695, %v1927_v59 }
 0x24e   :  { %5612 = vst [vmem:[#allocation7_spill] sm:$0xff] %v4834_v54  ;;  %v2102_v2 = vsel %vm41_vm0, %v4824_v0, 0.0  ;;  %v2103_v43 = vsel %vm41_vm0, %v4828_v34, 0.0  ;;  %v2127_v37 = vadd.f32 %v2126_v35, %v2125_v55  ;;  %v2128_v63 = vsel %vm41_vm0, %v4834_v54, 0.0  ;;  %v4864_v35 = vld [vmem:[%s5591_s1 + $0x140] sm:$0xff]  ;;  %v4875_v54 = vld [vmem:[%s5591_s1 + $0x188] sm:$0xff] }
 0x24f   :  { %v2027_v41 = vmul.f32 1.442695, %v1943_v13  ;;  %v1864_v51 = vmax.f32 %v1862_v15, %v1863_v3  ;;  %v1890_v52 = vrot.slane %v1889_v18, 4  ;;  %v1945_v24 = vsub.f32 %v4584_v1, %v4811_v10 }
 0x250   :  { %v4851_v6 = vpop.eup %3761  ;;  %v2029_v53 = vmul.f32 1.442695, %v1944_v57  ;;  %v1865_v60 = vsel %vm41_vm0, %v4845_v30, -inf  ;;  %v2100_v27 = vrot.slane %v2099_v28, 1  ;;  %v1997_v59 = vmul.f32 1.442695, %v1928_v58 }
 0x251   :  { %5613 = vst [vmem:[#allocation8_spill] sm:$0xff] %v4851_v6  ;;  %v4855_v14 = vpop.eup %3763  ;;  %v1837_v55 = vrot.slane %v1836_v19, 1  ;;  %3771 = vpow2.f32 %v1995_v49  ;;  %v2104_v13 = vadd.f32 %v2103_v43, %v2102_v2  ;;  %v2105_v15 = vsel %vm41_vm0, %v4851_v6, 0.0  ;;  %v4880_v49 = vld [vmem:[%s5591_s1 + $0x190] sm:$0xff] }
 0x252   :  { %5614 = vst [vmem:[#allocation9_spill] sm:$0xff] %v4855_v14  ;;  %v2129_v3 = vadd.f32 %v2128_v63, %v2127_v37  ;;  %v2130_v1 = vsel %vm41_vm0, %v4855_v14, 0.0  ;;  %3773 = vpow2.f32 %v2027_v41  ;;  %v1866_v57 = vmax.f32 %v1864_v51, %v1865_v60  ;;  %v4893_v51 = vld [vmem:[%s5591_s1 + $0x148] sm:$0x3] }
 0x253   :  { %v4868_v34 = vpop.eup %3765  ;;  %v1891_v58 = vmax.f32 %v1889_v18, %v1890_v52  ;;  %v1946_v43 = vsub.f32 %v4596_v32, %v4811_v10  ;;  %3775 = vpow2.f32 %v2029_v53  ;;  %v2031_v37 = vmul.f32 1.442695, %v1945_v24 }
 0x254   :  { %5615 = vst [vmem:[#allocation10_spill] sm:$0xff] %v4868_v34  ;;  %v4882_v2 = vpop.eup %3767  ;;  %v1867_v18 = vsel %vm41_vm0, %v4864_v35, -inf  ;;  %v2101_v63 = vadd.f32 %v2100_v27, %v2099_v28  ;;  %3777 = vpow2.f32 %v1997_v59  ;;  %v4888_v41 = vmax.f32 %v1836_v19, %v1837_v55  ;;  %v4908_v55 = vld [vmem:[%s5591_s1 + $0x198] sm:$0xff] }
 0x255   :  { %5616 = vst [vmem:[#allocation11_spill] sm:$0xff] %v4882_v2  ;;  %v2107_v52 = vsel %vm41_vm0, %v4868_v34, 0.0  ;;  %v2131_v60 = vadd.f32 %v2130_v1, %v2129_v3  ;;  %v1896_v32 = vsel %vm41_vm0, %v4875_v54, -inf  ;;  %v1897_v24 = vsel %vm41_vm0, %v4880_v49, -inf }
 0x256   :  { %v2106_v28 = vadd.f32 %v2105_v15, %v2104_v13  ;;  %v2132_v19 = vsel %vm1773_vm5, %v4882_v2, 0.0  ;;  %v1868_v27 = vmax.f32 %v1866_v57, %v1867_v18  ;;  %v1892_v59 = vrot.slane %v1891_v58, 2 }
 0x257   :  { %v4901_v53 = vpop.eup %3769  ;;  %v1947_v3 = vsub.f32 %v4610_v38, %v4811_v10  ;;  %3779 = vpow2.f32 %v2031_v37  ;;  %v2033_v1 = vmul.f32 1.442695, %v1946_v43  ;;  %v1869_v34 = vsel %vm1773_vm5, %v4893_v51, -inf  ;;  %v4923_v43 = vld [vmem:[%s5591_s1 + $0x1a0] sm:$0xff] }
 0x258   :  { %5617 = vst [vmem:[#allocation12_spill] sm:$0xff] %v4901_v53  ;;  %v1936_v13 = vsub.f32 %v4617_v31, %v4888_v41  ;;  %v1898_v15 = vmax.f32 %v1896_v32, %v1897_v24  ;;  %3781 = vrcp.f32 %v2101_v63  ;;  %v2133_v57 = vadd.f32 %v2132_v19, %v2131_v60  ;;  %5618 = vst [vmem:[#allocation13_spill] sm:$0xff] %v4923_v43 }
 0x259   :  { %v1937_v18 = vsub.f32 %v4622_v61, %v4888_v41  ;;  %v1899_v2 = vsel %vm41_vm0, %v4908_v55, -inf  ;;  %v2108_v6 = vadd.f32 %v2107_v52, %v2106_v28  ;;  %v1870_v14 = vmax.f32 %v1868_v27, %v1869_v34 }
 0x25a   :  { %v1893_v38 = vmax.f32 %v1891_v58, %v1892_v59  ;;  %v2109_v31 = vsel %vm41_vm0, %v4901_v53, 0.0  ;;  %v1948_v63 = vsub.f32 %v4635_v33, %v4811_v10  ;;  %3783 = vpow2.f32 %v2033_v1 }
 0x25b   :  { %v4925_v37 = vpop.eup %3771  ;;  %v2035_v61 = vmul.f32 1.442695, %v1947_v3  ;;  %v2013_v52 = vmul.f32 1.442695, %v1936_v13  ;;  %v1900_v34 = vmax.f32 %v1898_v15, %v1899_v2  ;;  %v2134_v32 = vrot.slane %v2133_v57, 4  ;;  %v4946_v2 = vld [vmem:[%s5591_s1 + $0x1a8] sm:$0xff] }
 0x25c   :  { %5619 = vst [vmem:[#allocation14_spill] sm:$0xff] %v4925_v37  ;;  %v4931_v60 = vpop.eup %3773  ;;  %v1938_v24 = vsub.f32 %v4646_v36, %v4888_v41  ;;  %v2015_v28 = vmul.f32 1.442695, %v1937_v18  ;;  %v1901_v19 = vsel %vm41_vm0, %v4923_v43, -inf  ;;  %v2110_v59 = vadd.f32 %v2109_v31, %v2108_v6 }
 0x25d   :  { %v4933_v58 = vpop.eup %3775  ;;  %v2111_v33 = vsel %vm41_vm0, %v4925_v37, 0.0  ;;  %v1871_v3 = vrot.slane %v1870_v14, 4  ;;  %v1894_v1 = vrot.slane %v1893_v38, 1  ;;  %v1939_v36 = vsub.f32 %v4666_v16, %v4888_v41 }
 0x25e   :  { %v4939_v27 = vpop.eup %3777  ;;  %v1949_v13 = vsub.f32 %v4657_v12, %v4811_v10  ;;  %3785 = vpow2.f32 %v2035_v61  ;;  %v2037_v15 = vmul.f32 1.442695, %v1948_v63  ;;  %v2159_v6 = vsel %vm41_vm0, %v4931_v60, 0.0  ;;  %v4965_v10 = vld [vmem:[%s5591_s1 + $0x1b0] sm:$0xff] }
 0x25f   :  { %3787 = vpow2.f32 %v2013_v52  ;;  %v2160_v18 = vsel %vm41_vm0, %v4933_v58, 0.0  ;;  %v1902_v31 = vmax.f32 %v1900_v34, %v1901_v19  ;;  %v2135_v53 = vadd.f32 %v2134_v32, %v2133_v57 }
 0x260   :  { %3789 = vpow2.f32 %v2015_v28  ;;  %v2017_v0 = vmul.f32 1.442695, %v1938_v24  ;;  %v1903_v16 = vsel %vm41_vm0, %v4946_v2, -inf  ;;  %v1872_v43 = vmax.f32 %v1870_v14, %v1871_v3 }
 0x261   :  { %v4956_v37 = vpop.eup %3779  ;;  %v4960_v12 = vmax.f32 %v1893_v38, %v1894_v1  ;;  %v2113_v61 = vsel %vm1773_vm5, %v4939_v27, 0.0  ;;  %3791 = vpow2.f32 %v2037_v15  ;;  %v2039_v57 = vmul.f32 1.442695, %v1949_v13 }
 0x262   :  { %v4967_v63 = vpop.eup %3781  ;;  %v2161_v52 = vadd.f32 %v2160_v18, %v2159_v6  ;;  %v2112_v34 = vadd.f32 %v2111_v33, %v2110_v59  ;;  %v1940_v32 = vsub.f32 %v4683_v4, %v4888_v41  ;;  %v2162_v14 = vsel %vm41_vm0, %v4956_v37, 0.0  ;;  %v4986_v4 = vld [vmem:[%s5591_s1 + $0x1b8] sm:$0x3]  ;;  %s3889_s1 = smov [#allocation2]  }
 0x263   :  { %v1904_v38 = vmax.f32 %v1902_v31, %v1903_v16  ;;  %v2136_v28 = vrot.slane %v2135_v53, 2  ;;  %3793 = vpow2.f32 %v2017_v0  ;;  %v2019_v19 = vmul.f32 1.442695, %v1939_v36  ;;  %s3215_s7 = sshll.u32 %s3889_s1, 4  ;;  %s3216_s7 = int_to_ptr.vmem [resolvable:$true] %s3215_s7 }
 0x264   :  { %v4975_v24 = vpop.eup %3783  ;;  %v1905_v3 = vsel %vm41_vm0, %v4965_v10, -inf  ;;  %v2251_v1 = vmul.f32 %v4967_v63, %v4604_v22  ;;  %v1873_v13 = vrot.slane %v1872_v43, 2  ;;  %v1957_v59 = vsub.f32 %v4692_v8, %v4960_v12  ;;  %s3861_s8 = scalar_lea.vmem %s3216_s7, 128  ;;  %p3866_p1 = scmp.lt.s32.totalorder %s3216_s7, %s3216_s7 }
 0x265   :  { %5620 = vst [vmem:[#allocation15_spill] sm:$0xff] %v4975_v24  ;;  %v1941_v33 = vsub.f32 %v4706_v50, %v4888_v41  ;;  %3795 = vpow2.f32 %v2039_v57  ;;  %v2163_v0 = vadd.f32 %v2162_v14, %v2161_v52  ;;  %v1958_v36 = vsub.f32 %v4697_v11, %v4960_v12  ;;  %p3862_p0 = scmp.ne.s32.totalorder %s3216_s7, %s3861_s8  ;;  %p3867_p2 = scmp.lt.s32.totalorder %s3861_s8, %s3861_s8 }
 0x266   :  { %v2114_v15 = vadd.f32 %v2113_v61, %v2112_v34  ;;  %v2021_v6 = vmul.f32 1.442695, %v1940_v32  ;;  %v2164_v22 = vsel %vm41_vm0, %v4975_v24, 0.0  ;;  %v1906_v18 = vmax.f32 %v1904_v38, %v1905_v3 }
 0x267   :  { %v2137_v31 = vadd.f32 %v2136_v28, %v2135_v53  ;;  %v1942_v16 = vsub.f32 %v4730_v40, %v4888_v41  ;;  %3797 = vpow2.f32 %v2019_v19  ;;  %v1907_v50 = vsel %vm1773_vm5, %v4986_v4, -inf  ;;  %p3868_p3 = por %p3867_p2, %p3866_p1 }
 0x268   :  { %v4994_v8 = vpop.eup %3785  ;;  %v2252_v11 = vmul.f32 %v4967_v63, %v4612_v29  ;;  %v2253_v61 = vmul.f32 %v4967_v63, %v4637_v56  ;;  %v1874_v52 = vmax.f32 %v1872_v43, %v1873_v13  ;;  %v2055_v34 = vmul.f32 1.442695, %v1957_v59 }
 0x269   :  { %v5000_v57 = vpop.eup %3787  ;;  %v2023_v14 = vmul.f32 1.442695, %v1941_v33  ;;  %v2165_v38 = vadd.f32 %v2164_v22, %v2163_v0  ;;  %v1959_v40 = vsub.f32 %v4719_v25, %v4960_v12  ;;  %v2057_v41 = vmul.f32 1.442695, %v1958_v36  ;;  %p3869_p4 = pnand %p3868_p3, %p3862_p0 }
 0x26a   :  { %5621 = vst [vmem:[#allocation16_spill] sm:$0xff] %v5000_v57  ;;  %v5006_v32 = vpop.eup %3789  ;;  %3799 = vpow2.f32 %v2021_v6  ;;  %v2166_v29 = vsel %vm41_vm0, %v4994_v8, 0.0  ;;  %v1908_v3 = vmax.f32 %v1906_v18, %v1907_v50  ;;  %v2115_v56 = vrot.slane %v2114_v15, 4 }
 0x26b   :  { %5622 = vst [vmem:[#allocation17_spill] sm:$0xff] %v5006_v32  ;;  %v5012_v24 = vpop.eup %3791  ;;  %v2138_v43 = vrot.slane %v2137_v31, 1  ;;  %v2025_v13 = vmul.f32 1.442695, %v1942_v16  ;;  %v2140_v59 = vsel %vm41_vm0, %v5000_v57, 0.0  ;;  %v2141_v25 = vsel %vm41_vm0, %v5006_v32, 0.0 }
 0x26c   :  { %3801 = vpow2.f32 %v2055_v34  ;;  %v2167_v6 = vadd.f32 %v2166_v29, %v2165_v38  ;;  %v1960_v22 = vsub.f32 %v4743_v21, %v4960_v12  ;;  %v2059_v18 = vmul.f32 1.442695, %v1959_v40 }
 0x26d   :  { %v5019_v0 = vpop.eup %3793  ;;  %3803 = vpow2.f32 %v2057_v41  ;;  %v2116_v34 = vadd.f32 %v2115_v56, %v2114_v15  ;;  %v2139_v32 = vadd.f32 %v2138_v43, %v2137_v31  ;;  %v2142_v57 = vadd.f32 %v2141_v25, %v2140_v59 }
 0x26e   :  { %3805 = vpow2.f32 %v2023_v14  ;;  %v2254_v38 = vmul.f32 %v4967_v63, %v4659_v62  ;;  %v2143_v21 = vsel %vm41_vm0, %v5019_v0, 0.0  ;;  %v1961_v15 = vsub.f32 %v4756_v48, %v4960_v12 }
 0x26f   :  { %3807 = vpow2.f32 %v2059_v18  ;;  %v2061_v31 = vmul.f32 1.442695, %v1960_v22  ;;  %v2117_v59 = vrot.slane %v2116_v34, 2 }
 0x270   :  { %3809 = vpow2.f32 %v2025_v13 }
 0x271   :  { %3811 = vrcp.f32 %v2139_v32  ;;  %v1962_v32 = vsub.f32 %v4781_v44, %v4960_v12 }
 0x272   :  { %3813 = vpow2.f32 %v2061_v31 }
 0x285   :  { %v601_v53 = vpop.f32.mrb[0].mxu1 }
 0x286   :  { %v2307_v28 = vmul.f32 %v2251_v1, %v601_v53  ;;  %v3442_v19 = vpop.f32.mrb[1].mxu1  ;;  %v1875_v1 = vrot.slane %v1874_v52, 1  ;;  %v2168_v53 = vsel %vm41_vm0, %v5012_v24, 0.0 }
 0x287   :  { %v5025_v19 = vpop.eup %3795  ;;  %v2169_v41 = vadd.f32 %v2168_v53, %v2167_v6  ;;  %v2118_v53 = vadd.f32 %v2117_v59, %v2116_v34  ;;  %v2065_v34 = vmul.f32 1.442695, %v1962_v32 }
 0x288   :  { %v2363_v33 = vsel %vm41_vm0, %v2307_v28, 0.0  ;;  %v1909_v28 = vrot.slane %v1908_v3, 4  ;;  %v5034_v14 = vpop.eup %3797  ;;  %v2170_v62 = vsel %vm1773_vm5, %v5025_v19, 0.0 }
 0x289   :  { %v606_v36 = vpop.f32.mrb[2].mxu1  ;;  %2364 = vadd.xlane.f32.xlu0 %v2363_v33  ;;  %v5040_v25 = vpop.eup %3799  ;;  %v2171_v6 = vadd.f32 %v2170_v62, %v2169_v41 }
 0x28a   :  { %v2308_v16 = vmul.f32 %v2252_v11, %v606_v36  ;;  %v3445_v50 = vpop.f32.mrb[3].mxu1  ;;  %v5032_v11 = vmax.f32 %v1874_v52, %v1875_v1  ;;  %v1910_v43 = vmax.f32 %v1908_v3, %v1909_v28  ;;  %v2144_v52 = vadd.f32 %v2143_v21, %v2142_v57  ;;  %v5051_v3 = vpop.eup %3801 }
 0x28b   :  { %v2145_v36 = vsel %vm41_vm0, %v5034_v14, 0.0  ;;  %v2063_v57 = vmul.f32 1.442695, %v1961_v15  ;;  %v2147_v44 = vsel %vm41_vm0, %v5040_v25, 0.0  ;;  %v2172_v15 = vrot.slane %v2171_v6, 4 }
 0x28c   :  { %v2366_v33 = vsel %vm41_vm0, %v2308_v16, 0.0  ;;  %v1950_v48 = vsub.f32 %v4771_v23, %v5032_v11  ;;  %v2255_v16 = vmul.f32 %v4967_v63, %v4674_v20  ;;  %v1911_v50 = vrot.slane %v1910_v43, 2  ;;  %v5055_v23 = vpop.eup %3803 }
 0x28d   :  { %v611_v40 = vpop.f32.mrb[4].mxu1  ;;  %2367 = vadd.xlane.f32.xlu1 %v2366_v33  ;;  %v2146_v28 = vadd.f32 %v2145_v36, %v2144_v52  ;;  %v5061_v33 = vpop.eup %3805  ;;  %3815 = vpow2.f32 %v2063_v57  ;;  %v2198_v62 = vsel %vm41_vm0, %v5055_v23, 0.0  ;;  %v2257_v52 = vmul.f32 %v4967_v63, %v4721_v5 }
 0x28e   :  { %v2309_v29 = vmul.f32 %v2253_v61, %v611_v40  ;;  %v3448_v56 = vpop.f32.mrb[5].mxu1  ;;  %v1951_v61 = vsub.f32 %v4776_v47, %v5032_v11  ;;  %v2256_v47 = vmul.f32 %v4967_v63, %v4685_v39  ;;  %v2041_v40 = vmul.f32 1.442695, %v1950_v48  ;;  %v5074_v59 = vpop.eup %3807 }
 0x28f   :  { %v1963_v39 = vsub.f32 %v4807_v42, %v4960_v12  ;;  %v2197_v56 = vsel %vm41_vm0, %v5051_v3, 0.0  ;;  %v2149_v42 = vsel %vm41_vm0, %v5061_v33, 0.0  ;;  %v5080_v12 = vpop.eup %3809  ;;  %v2148_v36 = vadd.f32 %v2147_v44, %v2146_v28 }
 0x290   :  { %v2369_v1 = vsel %vm41_vm0, %v2309_v29, 0.0  ;;  %v2043_v20 = vmul.f32 1.442695, %v1951_v61  ;;  %v1953_v48 = vsub.f32 %v4822_v9, %v5032_v11  ;;  %3817 = vpow2.f32 %v2041_v40 }
 0x291   :  { %v616_v13 = vpop.f32.mrb[6].mxu1  ;;  %2370 = vadd.xlane.f32.xlu1 %v2369_v1  ;;  %v2119_v1 = vrot.slane %v2118_v53, 1  ;;  %v2173_v32 = vadd.f32 %v2172_v15, %v2171_v6  ;;  %3819 = vpow2.f32 %v2065_v34  ;;  %v2067_v57 = vmul.f32 1.442695, %v1963_v39 }
 0x292   :  { %v2310_v22 = vmul.f32 %v2254_v38, %v616_v13  ;;  %v3451_v18 = vpop.f32.mrb[7].mxu1  ;;  %v1952_v38 = vsub.f32 %v4802_v26, %v5032_v11  ;;  %v1912_v26 = vmax.f32 %v1910_v43, %v1911_v50  ;;  %v5084_v13 = vpop.eup %3811  ;;  %3821 = vpow2.f32 %v2043_v20 }
 0x293   :  { %v2200_v18 = vsel %vm41_vm0, %v5074_v59, 0.0  ;;  %v5090_v50 = vpop.eup %3813  ;;  %v2120_v9 = vadd.f32 %v2119_v1, %v2118_v53  ;;  %v2265_v28 = vmul.f32 %v5084_v13, %v4760_v7  ;;  %v2150_v44 = vadd.f32 %v2149_v42, %v2148_v36 }
 0x294   :  { %v2372_v21 = vsel %vm41_vm0, %v2310_v22, 0.0  ;;  %v2045_v61 = vmul.f32 1.442695, %v1952_v38  ;;  %v2199_v22 = vadd.f32 %v2198_v62, %v2197_v56  ;;  %v2151_v6 = vsel %vm1773_vm5, %v5080_v12, 0.0 }
 0x295   :  { %v621_v41 = vpop.f32.mrb[8].mxu1  ;;  %2373 = vadd.xlane.f32.xlu1 %v2372_v21  ;;  %v2174_v38 = vrot.slane %v2173_v32, 2  ;;  %v2047_v40 = vmul.f32 1.442695, %v1953_v48  ;;  %3823 = vpow2.f32 %v2067_v57  ;;  %v2202_v53 = vsel %vm41_vm0, %v5090_v50, 0.0 }
 0x296   :  { %v5068_v31 = vmul.f32 %v2255_v16, %v621_v41  ;;  %v3454_v29 = vpop.f32.mrb[9].mxu1  ;;  %v1913_v16 = vrot.slane %v1912_v26, 1  ;;  %v2201_v20 = vadd.f32 %v2200_v18, %v2199_v22  ;;  %3825 = vpow2.f32 %v2045_v61 }
 0x297   :  { %v5104_v39 = vpop.eup %3815  ;;  %3827 = vrcp.f32 %v2120_v9  ;;  %v2152_v34 = vadd.f32 %v2151_v6, %v2150_v44  ;;  %v2175_v62 = vadd.f32 %v2174_v38, %v2173_v32  ;;  %v3888_v36 = vmov 0  }
 0x298   :  { %v5102_v7 = vmax.f32 %v1912_v26, %v1913_v16  ;;  %v2203_v42 = vadd.f32 %v2202_v53, %v2201_v20  ;;  %3684 = vset.pattern.permute.xlu1 %v3888_v36  ;;  %3683 = vset.pattern.permute.xlu0 %v3888_v36  ;;  %3829 = vpow2.f32 %v2047_v40  ;;  %v2267_v18 = vmul.f32 %v5084_v13, %v4789_v17 }
 0x299   :  { %v626_v43 = vpop.f32.mrb[10].mxu1  ;;  %v2153_v16 = vrot.slane %v2152_v34, 4  ;;  %v2176_v44 = vrot.slane %v2175_v62, 1 }
 0x29a   :  { %v5086_v5 = vmul.f32 %v2256_v47, %v626_v43  ;;  %v3457_v63 = vpop.f32.mrb[11].mxu1  ;;  %v1954_v47 = vsub.f32 %v4845_v30, %v5032_v11  ;;  %v2266_v30 = vmul.f32 %v5084_v13, %v4762_v45  ;;  %v5112_v26 = vpop.eup %3817  ;;  %v2204_v45 = vsel %vm41_vm0, %v5104_v39, 0.0 }
 0x29b   :  { %v1964_v32 = vsub.f32 %v4875_v54, %v5102_v7  ;;  %v5118_v57 = vpop.eup %3819  ;;  %v1956_v54 = vsub.f32 %v4893_v51, %v5032_v11  ;;  %v1966_v51 = vsub.f32 %v4908_v55, %v5102_v7  ;;  %v2177_v55 = vadd.f32 %v2176_v44, %v2175_v62  ;;  %v5624_v44 = vld [vmem:[#allocation5_spill] sm:$0xff] }
 0x29c   :  { %v2049_v1 = vmul.f32 1.442695, %v1954_v47  ;;  %v5122_v22 = vpop.eup %3821  ;;  %v2205_v47 = vadd.f32 %v2204_v45, %v2203_v42  ;;  %v2206_v40 = vsel %vm41_vm0, %v5118_v57, 0.0  ;;  %v2154_v42 = vadd.f32 %v2153_v16, %v2152_v34  ;;  %v5623_v34 = vld [vmem:[#allocation13_spill] sm:$0xff] }
 0x29d   :  { %v631_v21 = vpop.f32.mrb[12].mxu1  ;;  %v2069_v20 = vmul.f32 1.442695, %v1964_v32  ;;  %v2179_v53 = vsel %vm41_vm0, %v5122_v22, 0.0  ;;  %v1967_v16 = vsub.f32 %v5623_v34, %v5102_v7 }
 0x29e   :  { %v5098_v41 = vmul.f32 %v2257_v52, %v631_v21  ;;  %v3460_v15 = vpop.f32.mrb[13].mxu1  ;;  %v1955_v52 = vsub.f32 %v4864_v35, %v5032_v11  ;;  %v1965_v35 = vsub.f32 %v4880_v49, %v5102_v7  ;;  %3831 = vpow2.f32 %v2049_v1 }
 0x29f   :  { %v5133_v17 = vpop.eup %3823  ;;  %v2178_v15 = vsel %vm41_vm0, %v5112_v26, 0.0  ;;  %v2268_v1 = vmul.f32 %v5084_v13, %v4813_v46  ;;  %v2207_v45 = vadd.f32 %v2206_v40, %v2205_v47 }
 0x2a0   :  { %v2051_v6 = vmul.f32 1.442695, %v1955_v52  ;;  %v2071_v11 = vmul.f32 1.442695, %v1965_v35 }
 0x2a1   :  { %v5108_v29 = vpop.f32.mrb[14].mxu1  ;;  %v907_v56 = vpop.f32.mrb[16].mxu0 }
 0x2a2   :  { %v2321_v48 = vmul.f32 %v2265_v28, %v907_v56  ;;  %v3467_v61 = vpop.f32.mrb[15].mxu1  ;;  %v3492_v43 = vpop.f32.mrb[17].mxu0  ;;  %v2375_v56 = vsel %vm41_vm0, %v5068_v31, 0.0  ;;  %3833 = vpow2.f32 %v2051_v6  ;;  %v2378_v6 = vsel %vm41_vm0, %v5086_v5, 0.0 }
 0x2a3   :  { %v2053_v43 = vmul.f32 1.442695, %v1956_v54  ;;  %3835 = vpow2.f32 %v2069_v20  ;;  %v1968_v5 = vsub.f32 %v4946_v2, %v5102_v7 }
 0x2a4   :  { %v2405_v63 = vsel %vm41_vm0, %v2321_v48, 0.0  ;;  %3837 = vpow2.f32 %v2071_v11 }
 0x2a5   :  { %v5127_v9 = vpop.f32.mrb[16].mxu1  ;;  %2406 = vadd.xlane.f32.xlu0 %v2405_v63  ;;  %v912_v28 = vpop.f32.mrb[18].mxu0  ;;  %v2180_v63 = vadd.f32 %v2179_v53, %v2178_v15  ;;  %3839 = vrcp.f32 %v2177_v55 }
 0x2a6   :  { %v2322_v21 = vmul.f32 %v2266_v30, %v912_v28  ;;  %v3470_v49 = vpop.f32.mrb[17].mxu1  ;;  %v3495_v38 = vpop.f32.mrb[19].mxu0  ;;  %v2208_v28 = vsel %vm1773_vm5, %v5133_v17, 0.0  ;;  %3841 = vpow2.f32 %v2053_v43 }
 0x2a7   :  { %v5141_v30 = vpop.eup %3825  ;;  %v2155_v38 = vrot.slane %v2154_v42, 2  ;;  %v2209_v40 = vadd.f32 %v2208_v28, %v2207_v45 }
 0x2a8   :  { %v2408_v52 = vsel %vm41_vm0, %v2322_v21, 0.0  ;;  %v5148_v36 = vpop.eup %3827  ;;  %v2181_v46 = vsel %vm41_vm0, %v5141_v30, 0.0  ;;  %v2073_v21 = vmul.f32 1.442695, %v1966_v51  ;;  %v5625_v51 = vld [vmem:[#allocation7_spill] sm:$0xff] }
 0x2a9   :  { %v5150_v48 = vpop.f32.mrb[18].mxu1  ;;  %2376 = vadd.xlane.f32.xlu0 %v2375_v56  ;;  %v917_v61 = vpop.f32.mrb[20].mxu0  ;;  %2409 = vadd.xlane.f32.xlu1 %v2408_v52  ;;  %v2269_v11 = vmul.f32 %v5084_v13, %v5625_v51  ;;  %v2182_v56 = vadd.f32 %v2181_v46, %v2180_v63  ;;  %v2156_v2 = vadd.f32 %v2155_v38, %v2154_v42  ;;  %v2210_v28 = vrot.slane %v2209_v40, 4  ;;  %v5628_v38 = vld [vmem:[#allocation8_spill] sm:$0xff] }
 0x2aa   :  { %v2323_v32 = vmul.f32 %v2267_v18, %v917_v61  ;;  %v3473_v35 = vpop.f32.mrb[19].mxu1  ;;  %v3498_v31 = vpop.f32.mrb[21].mxu0  ;;  %v2258_v18 = vmul.f32 %v5148_v36, %v5624_v44  ;;  %3843 = vpow2.f32 %v2073_v21  ;;  %v2075_v61 = vmul.f32 1.442695, %v1967_v16  ;;  %v5627_v21 = vld [vmem:[#allocation9_spill] sm:$0xff] }
 0x2ab   :  { %v5158_v62 = vpop.eup %3829  ;;  %v2381_v35 = vsel %vm1773_vm5, %v5098_v41, 0.0 }
 0x2ac   :  { %v2411_v54 = vsel %vm41_vm0, %v2323_v32, 0.0  ;;  %v2183_v52 = vsel %vm41_vm0, %v5158_v62, 0.0  ;;  %v5173_v32 = vpop.eup %3831  ;;  %v2314_v55 = vmul.f32 %v2258_v18, %v5108_v29  ;;  %v2270_v29 = vmul.f32 %v5084_v13, %v5627_v21 }
 0x2ad   :  { %v5165_v47 = vpop.f32.mrb[20].mxu1  ;;  %2412 = vadd.xlane.f32.xlu0 %v2411_v54  ;;  %v922_v49 = vpop.f32.mrb[22].mxu0  ;;  %2379 = vadd.xlane.f32.xlu1 %v2378_v6  ;;  %v2184_v44 = vadd.f32 %v2183_v52, %v2182_v56  ;;  %v2185_v41 = vsel %vm41_vm0, %v5173_v32, 0.0  ;;  %v1969_v54 = vsub.f32 %v4965_v10, %v5102_v7  ;;  %3845 = vpow2.f32 %v2075_v61  ;;  %v5629_v10 = vld [vmem:[#allocation11_spill] sm:$0xff] }
 0x2ae   :  { %v2324_v20 = vmul.f32 %v2268_v1, %v922_v49  ;;  %v3476_v15 = vpop.f32.mrb[21].mxu1  ;;  %v3501_v53 = vpop.f32.mrb[23].mxu0  ;;  %v5626_v1 = vld [vmem:[#allocation6_spill] sm:$0xff]  ;;  %v2077_v6 = vmul.f32 1.442695, %v1968_v5  ;;  %v2271_v52 = vmul.f32 %v5084_v13, %v5629_v10  ;;  %v2157_v5 = vrot.slane %v2156_v2, 1 }
 0x2af   :  { %v2259_v45 = vmul.f32 %v5148_v36, %v5626_v1  ;;  %v5185_v18 = vpop.eup %3833  ;;  %v2384_v53 = vsel %vm41_vm0, %v2314_v55, 0.0  ;;  %v2211_v61 = vadd.f32 %v2210_v28, %v2209_v40  ;;  %v5630_v10 = vld [vmem:[#allocation10_spill] sm:$0xff] }
 0x2b0   :  { %v2414_v43 = vsel %vm41_vm0, %v2324_v20, 0.0  ;;  %v5191_v49 = vpop.eup %3835  ;;  %v2260_v20 = vmul.f32 %v5148_v36, %v5628_v38  ;;  %v2187_v55 = vsel %vm41_vm0, %v5185_v18, 0.0  ;;  %3847 = vpow2.f32 %v2077_v6 }
 0x2b1   :  { %v5181_v31 = vpop.f32.mrb[22].mxu1  ;;  %2382 = vadd.xlane.f32.xlu0 %v2381_v35  ;;  %v927_v63 = vpop.f32.mrb[24].mxu0  ;;  %2415 = vadd.xlane.f32.xlu1 %v2414_v43  ;;  %v2315_v42 = vmul.f32 %v2259_v45, %v5127_v9  ;;  %v2264_v35 = vmul.f32 %v5148_v36, %v4939_v27  ;;  %v2186_v43 = vadd.f32 %v2185_v41, %v2184_v44  ;;  %v2216_v13 = vsel %vm41_vm0, %v5191_v49, 0.0 }
 0x2b2   :  { %v2325_v46 = vmul.f32 %v2269_v11, %v927_v63  ;;  %v3479_v34 = vpop.f32.mrb[23].mxu1  ;;  %v3504_v16 = vpop.f32.mrb[25].mxu0  ;;  %v2316_v28 = vmul.f32 %v2260_v20, %v5150_v48  ;;  %v2212_v41 = vrot.slane %v2211_v61, 2 }
 0x2b3   :  { %v5198_v51 = vpop.eup %3837  ;;  %v2079_v34 = vmul.f32 1.442695, %v1969_v54  ;;  %v2387_v27 = vsel %vm41_vm0, %v2315_v42, 0.0  ;;  %v2188_v20 = vadd.f32 %v2187_v55, %v2186_v43 }
 0x2b4   :  { %v2417_v15 = vsel %vm41_vm0, %v2325_v46, 0.0  ;;  %v5208_v63 = vpop.eup %3839  ;;  %v1970_v46 = vsub.f32 %v4986_v4, %v5102_v7  ;;  %v2217_v21 = vsel %vm41_vm0, %v5198_v51, 0.0  ;;  %v2158_v7 = vadd.f32 %v2157_v5, %v2156_v2 }
 0x2b5   :  { %v5200_v11 = vpop.f32.mrb[24].mxu1  ;;  %2418 = vadd.xlane.f32.xlu0 %v2417_v15  ;;  %v932_v56 = vpop.f32.mrb[26].mxu0  ;;  %2385 = vadd.xlane.f32.xlu1 %v2384_v53  ;;  %v2279_v42 = vmul.f32 %v5208_v63, %v4931_v60  ;;  %3849 = vpow2.f32 %v2079_v34  ;;  %v2390_v5 = vsel %vm41_vm0, %v2316_v28, 0.0  ;;  %v2280_v34 = vmul.f32 %v5208_v63, %v4933_v58 }
 0x2b6   :  { %v2326_v9 = vmul.f32 %v2270_v29, %v932_v56  ;;  %v3482_v1 = vpop.f32.mrb[25].mxu1  ;;  %v3507_v45 = vpop.f32.mrb[27].mxu0  ;;  %v2081_v53 = vmul.f32 1.442695, %v1970_v46  ;;  %v2218_v56 = vadd.f32 %v2217_v21, %v2216_v13  ;;  %3851 = vrcp.f32 %v2158_v7 }
 0x2b7   :  { %v5214_v40 = vpop.eup %3841 }
 0x2b8   :  { %v2420_v16 = vsel %vm41_vm0, %v2326_v9, 0.0  ;;  %v5221_v29 = vpop.eup %3843  ;;  %v2189_v15 = vsel %vm1773_vm5, %v5214_v40, 0.0  ;;  %v2261_v9 = vmul.f32 %v5148_v36, %v5630_v10  ;;  %3853 = vpow2.f32 %v2081_v53 }
 0x2b9   :  { %v784_v44 = vpop.f32.mrb[26].mxu1  ;;  %2388 = vadd.xlane.f32.xlu0 %v2387_v27  ;;  %v937_v4 = vpop.f32.mrb[28].mxu0  ;;  %2421 = vadd.xlane.f32.xlu1 %v2420_v16  ;;  %v2190_v13 = vadd.f32 %v2189_v15, %v2188_v20  ;;  %v5631_v16 = vld [vmem:[#allocation12_spill] sm:$0xff]  ;;  %v5632_v20 = vld [vmem:[#allocation14_spill] sm:$0xff] }
 0x2ba   :  { %v5223_v54 = vmul.f32 %v2264_v35, %v784_v44  ;;  %v2327_v6 = vmul.f32 %v2271_v52, %v937_v4  ;;  %v3485_v38 = vpop.f32.mrb[27].mxu1  ;;  %v3510_v48 = vpop.f32.mrb[29].mxu0  ;;  %v2219_v52 = vsel %vm41_vm0, %v5221_v29, 0.0  ;;  %v2213_v35 = vadd.f32 %v2212_v41, %v2211_v61 }
 0x2bb   :  { %v5235_v1 = vpop.eup %3845  ;;  %v2220_v28 = vadd.f32 %v2219_v52, %v2218_v56  ;;  %v2317_v27 = vmul.f32 %v2261_v9, %v5165_v47  ;;  %v2262_v21 = vmul.f32 %v5148_v36, %v5631_v16  ;;  %v2281_v47 = vmul.f32 %v5208_v63, %v4956_v37 }
 0x2bc   :  { %v2423_v2 = vsel %vm1773_vm5, %v2327_v6, 0.0  ;;  %v2221_v61 = vsel %vm41_vm0, %v5235_v1, 0.0  ;;  %v5247_v4 = vpop.eup %3847  ;;  %v2214_v6 = vrot.slane %v2213_v35, 1  ;;  %v2263_v15 = vmul.f32 %v5148_v36, %v5632_v20 }
 0x2bd   :  { %v5237_v60 = vpop.f32.mrb[28].mxu1  ;;  %2424 = vadd.xlane.f32.xlu0 %v2423_v2  ;;  %v1213_v45 = vpop.f32.mrb[30].mxu0  ;;  %2391 = vadd.xlane.f32.xlu1 %v2390_v5  ;;  %v2222_v53 = vadd.f32 %v2221_v61, %v2220_v28  ;;  %v2318_v56 = vmul.f32 %v2262_v21, %v5181_v31  ;;  %v2393_v10 = vsel %vm41_vm0, %v2317_v27, 0.0  ;;  %v2223_v2 = vsel %vm41_vm0, %v5247_v4, 0.0 }
 0x2be   :  { %v2335_v43 = vmul.f32 %v2279_v42, %v1213_v45  ;;  %v3517_v55 = vpop.f32.mrb[29].mxu1  ;;  %v3542_v46 = vpop.f32.mrb[31].mxu0  ;;  %v2191_v42 = vrot.slane %v2190_v13, 4  ;;  %v2215_v45 = vadd.f32 %v2214_v6, %v2213_v35  ;;  %v2319_v16 = vmul.f32 %v2263_v15, %v5200_v11  ;;  %v5635_v15 = vld [vmem:[#allocation17_spill] sm:$0xff] }
 0x2bf   :  { %v5258_v5 = vpop.eup %3849  ;;  %v5633_v46 = vld [vmem:[#allocation15_spill] sm:$0xff]  ;;  %v2224_v28 = vadd.f32 %v2223_v2, %v2222_v53  ;;  %v2283_v11 = vmul.f32 %v5208_v63, %v4994_v8 }
 0x2c0   :  { %v2447_v44 = vsel %vm41_vm0, %v2335_v43, 0.0  ;;  %v2282_v31 = vmul.f32 %v5208_v63, %v5633_v46  ;;  %v5264_v27 = vpop.eup %3851  ;;  %v2225_v61 = vsel %vm41_vm0, %v5258_v5, 0.0  ;;  %3855 = vrcp.f32 %v2215_v45 }
 0x2c1   :  { %v1065_v7 = vpop.f32.mrb[30].mxu1  ;;  %2448 = vadd.xlane.f32.xlu0 %v2447_v44  ;;  %v1218_v41 = vpop.f32.mrb[32].mxu0  ;;  %v2396_v44 = vsel %vm41_vm0, %v2318_v56, 0.0  ;;  %v2226_v20 = vadd.f32 %v2225_v61, %v2224_v28  ;;  %v2273_v53 = vmul.f32 %v5264_v27, %v5635_v15  ;;  %v2399_v56 = vsel %vm41_vm0, %v2319_v16, 0.0 }
 0x2c2   :  { %v2336_v58 = vmul.f32 %v2280_v34, %v1218_v41  ;;  %v3520_v38 = vpop.f32.mrb[31].mxu1  ;;  %v3545_v48 = vpop.f32.mrb[33].mxu0  ;;  %v2192_v34 = vadd.f32 %v2191_v42, %v2190_v13 }
 0x2c3   :  { %v5271_v35 = vpop.eup %3853  ;;  %v2329_v28 = vmul.f32 %v2273_v53, %v1065_v7  ;;  %v2274_v7 = vmul.f32 %v5264_v27, %v5019_v0 }
 0x2c4   :  { %v2450_v9 = vsel %vm41_vm0, %v2336_v58, 0.0  ;;  %v2193_v48 = vrot.slane %v2192_v34, 2 }
 0x2c5   :  { %v5260_v52 = vpop.f32.mrb[32].mxu1  ;;  %2394 = vadd.xlane.f32.xlu0 %v2393_v10  ;;  %v1223_v37 = vpop.f32.mrb[34].mxu0  ;;  %2451 = vadd.xlane.f32.xlu1 %v2450_v9  ;;  %v2227_v9 = vsel %vm1773_vm5, %v5271_v35, 0.0 }
 0x2c6   :  { %v2337_v43 = vmul.f32 %v2281_v47, %v1223_v37  ;;  %v3523_v36 = vpop.f32.mrb[33].mxu1  ;;  %v3548_v55 = vpop.f32.mrb[35].mxu0  ;;  %v5634_v47 = vld [vmem:[#allocation16_spill] sm:$0xff]  ;;  %v2228_v46 = vadd.f32 %v2227_v9, %v2226_v20  ;;  %v2330_v0 = vmul.f32 %v2274_v7, %v5260_v52 }
 0x2c7   :  { %v2272_v42 = vmul.f32 %v5264_v27, %v5634_v47  ;;  %v2194_v36 = vadd.f32 %v2193_v48, %v2192_v34  ;;  %v2284_v55 = vmul.f32 %v5208_v63, %v5012_v24  ;;  %v2285_v34 = vmul.f32 %v5208_v63, %v5025_v19 }
 0x2c8   :  { %v2453_v21 = vsel %vm41_vm0, %v2337_v43, 0.0 }
 0x2c9   :  { %v5273_v41 = vpop.f32.mrb[34].mxu1  ;;  %2454 = vadd.xlane.f32.xlu0 %v2453_v21  ;;  %v1228_v6 = vpop.f32.mrb[36].mxu0  ;;  %2397 = vadd.xlane.f32.xlu1 %v2396_v44  ;;  %v2402_v21 = vsel %vm1773_vm5, %v5223_v54, 0.0  ;;  %v2195_v24 = vrot.slane %v2194_v36, 1  ;;  %v2429_v54 = vsel %vm41_vm0, %v2329_v28, 0.0 }
 0x2ca   :  { %v2338_v13 = vmul.f32 %v2282_v31, %v1228_v6  ;;  %v3526_v58 = vpop.f32.mrb[35].mxu1  ;;  %v3551_v38 = vpop.f32.mrb[37].mxu0  ;;  %v2328_v31 = vmul.f32 %v2272_v42, %v5237_v60  ;;  %v2229_v60 = vrot.slane %v2228_v46, 4 }
 0x2cb   :  { %v5297_v58 = vpop.eup %3855  ;;  %v2196_v63 = vadd.f32 %v2195_v24, %v2194_v36 }
 0x2cc   :  { %v2456_v10 = vsel %vm41_vm0, %v2338_v13, 0.0  ;;  %v2293_v15 = vmul.f32 %v5297_v58, %v5051_v3  ;;  %v2230_v53 = vadd.f32 %v2229_v60, %v2228_v46  ;;  %v2294_v3 = vmul.f32 %v5297_v58, %v5055_v23 }
 0x2cd   :  { %v5285_v2 = vpop.f32.mrb[36].mxu1  ;;  %2400 = vadd.xlane.f32.xlu0 %v2399_v56  ;;  %v1233_v37 = vpop.f32.mrb[38].mxu0  ;;  %2457 = vadd.xlane.f32.xlu1 %v2456_v10  ;;  %v2275_v56 = vmul.f32 %v5264_v27, %v5034_v14  ;;  %3857 = vrcp.f32 %v2196_v63  ;;  %v2276_v14 = vmul.f32 %v5264_v27, %v5040_v25  ;;  %v2295_v23 = vmul.f32 %v5297_v58, %v5074_v59 }
 0x2ce   :  { %v2339_v8 = vmul.f32 %v2283_v11, %v1233_v37  ;;  %v3529_v45 = vpop.f32.mrb[37].mxu1  ;;  %v3554_v43 = vpop.f32.mrb[39].mxu0  ;;  %v2426_v11 = vsel %vm41_vm0, %v2328_v31, 0.0  ;;  %v2231_v52 = vrot.slane %v2230_v53, 2  ;;  %v2432_v31 = vsel %vm41_vm0, %v2330_v0, 0.0 }
 0x2cf   :  { %v2277_v25 = vmul.f32 %v5264_v27, %v5061_v33  ;;  %v2296_v59 = vmul.f32 %v5297_v58, %v5090_v50  ;;  %v2278_v33 = vmul.f32 %v5264_v27, %v5080_v12  ;;  %v2297_v50 = vmul.f32 %v5297_v58, %v5104_v39 }
 0x2d0   :  { %v2459_v16 = vsel %vm41_vm0, %v2339_v8, 0.0  ;;  %v2298_v39 = vmul.f32 %v5297_v58, %v5118_v57 }
 0x2d1   :  { %v5293_v44 = vpop.f32.mrb[38].mxu1  ;;  %2460 = vadd.xlane.f32.xlu0 %v2459_v16  ;;  %v1238_v61 = vpop.f32.mrb[40].mxu0  ;;  %2403 = vadd.xlane.f32.xlu1 %v2402_v21 }
 0x2d2   :  { %v3532_v6 = vpop.f32.mrb[39].mxu1  ;;  %v3557_v13 = vpop.f32.mrb[41].mxu0  ;;  %v2340_v38 = vmul.f32 %v2284_v55, %v1238_v61  ;;  %v2331_v55 = vmul.f32 %v2275_v56, %v5273_v41  ;;  %v2332_v41 = vmul.f32 %v2276_v14, %v5285_v2  ;;  %v2333_v2 = vmul.f32 %v2277_v25, %v5293_v44 }
 0x2d3   :  { %v2232_v13 = vadd.f32 %v2231_v52, %v2230_v53 }
 0x2d4   :  { %v2462_v9 = vsel %vm41_vm0, %v2340_v38, 0.0  ;;  %v2441_v27 = vsel %vm41_vm0, %v2333_v2, 0.0 }
 0x2d5   :  { %v5303_v48 = vpop.f32.mrb[40].mxu1  ;;  %2430 = vadd.xlane.f32.xlu0 %v2429_v54  ;;  %v1243_v47 = vpop.f32.mrb[42].mxu0  ;;  %2427 = vadd.xlane.f32.xlu1 %v2426_v11 }
 0x2d6   :  { %v2341_v42 = vmul.f32 %v2285_v34, %v1243_v47  ;;  %v3535_v20 = vpop.f32.mrb[41].mxu1  ;;  %v3560_v19 = vpop.f32.mrb[43].mxu0  ;;  %v2435_v34 = vsel %vm41_vm0, %v2331_v55, 0.0  ;;  %v2233_v47 = vrot.slane %v2232_v13, 1 }
 0x2d7   :  { %v2438_v19 = vsel %vm41_vm0, %v2332_v41, 0.0 }
 0x2d8   :  { %v2465_v10 = vsel %vm1773_vm5, %v2341_v42, 0.0  ;;  %v3858_v42 = vpop.eup %3857  ;;  %v2234_v44 = vadd.f32 %v2233_v47, %v2232_v13 }
 0x2d9   :  { %v5312_v37 = vpop.f32.mrb[42].mxu1  ;;  %2466 = vadd.xlane.f32.xlu0 %v2465_v10  ;;  %v1519_v8 = vpop.f32.mrb[44].mxu0  ;;  %2463 = vadd.xlane.f32.xlu1 %v2462_v9  ;;  %v2286_v10 = vmul.f32 %v3858_v42, %v5112_v26  ;;  %v2334_v9 = vmul.f32 %v2278_v33, %v5303_v48  ;;  %v2287_v12 = vmul.f32 %v3858_v42, %v5122_v22 }
 0x2da   :  { %v2349_v45 = vmul.f32 %v2293_v15, %v1519_v8  ;;  %v3567_v43 = vpop.f32.mrb[43].mxu1  ;;  %v3592_v36 = vpop.f32.mrb[45].mxu0  ;;  %3859 = vrcp.f32 %v2234_v44  ;;  %v2289_v57 = vmul.f32 %v3858_v42, %v5158_v62 }
 0x2db   :  { %v2342_v26 = vmul.f32 %v2286_v10, %v5312_v37  ;;  %v2444_v55 = vsel %vm1773_vm5, %v2334_v9, 0.0 }
 0x2dc   :  { %v2489_v46 = vsel %vm41_vm0, %v2349_v45, 0.0 }
 0x2dd   :  { %v1371_v28 = vpop.f32.mrb[44].mxu1  ;;  %2490 = vadd.xlane.f32.xlu0 %v2489_v46  ;;  %v1524_v16 = vpop.f32.mrb[46].mxu0  ;;  %2433 = vadd.xlane.f32.xlu1 %v2432_v31 }
 0x2de   :  { %v2350_v21 = vmul.f32 %v2294_v3, %v1524_v16  ;;  %v3570_v61 = vpop.f32.mrb[45].mxu1  ;;  %v3595_v6 = vpop.f32.mrb[47].mxu0  ;;  %v2343_v48 = vmul.f32 %v2287_v12, %v1371_v28  ;;  %v2468_v28 = vsel %vm41_vm0, %v2342_v26, 0.0 }
 0x2df   :  { %v2288_v61 = vmul.f32 %v3858_v42, %v5141_v30 }
 0x2e0   :  { %v2492_v24 = vsel %vm41_vm0, %v2350_v21, 0.0  ;;  %v2299_v21 = vmul.f32 %v5297_v58, %v5133_v17  ;;  %v2471_v37 = vsel %vm41_vm0, %v2343_v48, 0.0  ;;  %v2291_v17 = vmul.f32 %v3858_v42, %v5185_v18 }
 0x2e1   :  { %v1376_v60 = vpop.f32.mrb[46].mxu1  ;;  %2436 = vadd.xlane.f32.xlu0 %v2435_v34  ;;  %v1529_v7 = vpop.f32.mrb[48].mxu0  ;;  %2493 = vadd.xlane.f32.xlu1 %v2492_v24  ;;  %v2290_v24 = vmul.f32 %v3858_v42, %v5173_v32 }
 0x2e2   :  { %v2351_v38 = vmul.f32 %v2295_v23, %v1529_v7  ;;  %v3573_v54 = vpop.f32.mrb[47].mxu1  ;;  %v3598_v11 = vpop.f32.mrb[49].mxu0  ;;  %v2344_v58 = vmul.f32 %v2288_v61, %v1376_v60 }
 0x2e4   :  { %v2495_v20 = vsel %vm41_vm0, %v2351_v38, 0.0  ;;  %v3860_v38 = vpop.eup %3859  ;;  %v2474_v18 = vsel %vm41_vm0, %v2344_v58, 0.0 }
 0x2e5   :  { %v1381_v63 = vpop.f32.mrb[48].mxu1  ;;  %2496 = vadd.xlane.f32.xlu0 %v2495_v20  ;;  %v1534_v15 = vpop.f32.mrb[50].mxu0  ;;  %2439 = vadd.xlane.f32.xlu1 %v2438_v19  ;;  %v2301_v47 = vmul.f32 %v3860_v38, %v5198_v51  ;;  %v2300_v19 = vmul.f32 %v3860_v38, %v5191_v49 }
 0x2e6   :  { %v2352_v53 = vmul.f32 %v2296_v59, %v1534_v15  ;;  %v3576_v0 = vpop.f32.mrb[49].mxu1  ;;  %v3601_v56 = vpop.f32.mrb[51].mxu0  ;;  %v2345_v30 = vmul.f32 %v2289_v57, %v1381_v63  ;;  %v2292_v59 = vmul.f32 %v3858_v42, %v5214_v40 }
 0x2e7   :  { %v2303_v0 = vmul.f32 %v3860_v38, %v5235_v1  ;;  %v2304_v1 = vmul.f32 %v3860_v38, %v5247_v4 }
 0x2e8   :  { %v2498_v8 = vsel %vm41_vm0, %v2352_v53, 0.0  ;;  %v2477_v32 = vsel %vm41_vm0, %v2345_v30, 0.0 }
 0x2e9   :  { %v1386_v45 = vpop.f32.mrb[50].mxu1  ;;  %2442 = vadd.xlane.f32.xlu0 %v2441_v27  ;;  %v1539_v43 = vpop.f32.mrb[52].mxu0  ;;  %2499 = vadd.xlane.f32.xlu1 %v2498_v8 }
 0x2ea   :  { %v2353_v36 = vmul.f32 %v2297_v50, %v1539_v43  ;;  %v3579_v3 = vpop.f32.mrb[51].mxu1  ;;  %v3604_v52 = vpop.f32.mrb[53].mxu0  ;;  %v2346_v2 = vmul.f32 %v2290_v24, %v1386_v45  ;;  %v2302_v50 = vmul.f32 %v3860_v38, %v5221_v29 }
 0x2eb   :  { %v5368_v27 = vpop.permute.xlu1 %2598  ;;  %v2305_v3 = vmul.f32 %v3860_v38, %v5258_v5 }
 0x2ec   :  { %v2501_v22 = vsel %vm41_vm0, %v2353_v36, 0.0  ;;  %v2480_v40 = vsel %vm41_vm0, %v2346_v2, 0.0 }
 0x2ed   :  { %v1391_v14 = vpop.f32.mrb[52].mxu1  ;;  %2502 = vadd.xlane.f32.xlu0 %v2501_v22  ;;  %v1544_v46 = vpop.f32.mrb[54].mxu0  ;;  %2445 = vadd.xlane.f32.xlu1 %v2444_v55 }
 0x2ee   :  { %v3582_v31 = vpop.f32.mrb[53].mxu1  ;;  %v3607_v16 = vpop.f32.mrb[55].mxu0  ;;  %v2354_v6 = vmul.f32 %v2298_v39, %v1544_v46  ;;  %v2347_v33 = vmul.f32 %v2291_v17, %v1391_v14  ;;  %v2306_v46 = vmul.f32 %v3860_v38, %v5271_v35 }
 0x2ef   :  { %v5375_v26 = vpop.permute.xlu1 %2602  ;;  %v5377_v22 = vpop.permute.xlu0 %2594 }
 0x2f0   :  { %v2504_v7 = vsel %vm41_vm0, %v2354_v6, 0.0  ;;  %v2483_v53 = vsel %vm41_vm0, %v2347_v33, 0.0 }
 0x2f1   :  { %v1396_v23 = vpop.f32.mrb[54].mxu1  ;;  %2472 = vadd.xlane.f32.xlu0 %v2471_v37  ;;  %v1549_v13 = vpop.f32.mrb[56].mxu0  ;;  %2469 = vadd.xlane.f32.xlu1 %v2468_v28 }
 0x2f2   :  { %v2355_v41 = vmul.f32 %v2299_v21, %v1549_v13  ;;  %v3585_v25 = vpop.f32.mrb[55].mxu1  ;;  %v3610_v34 = vpop.f32.mrb[57].mxu0  ;;  %v2348_v63 = vmul.f32 %v2292_v59, %v1396_v23 }
 0x2f3   :  { %v5382_v61 = vpop.permute.xlu1 %2610  ;;  %v5384_v57 = vpop.permute.xlu0 %2606 }
 0x2f4   :  { %v2507_v62 = vsel %vm1773_vm5, %v2355_v41, 0.0  ;;  %v2486_v10 = vsel %vm1773_vm5, %v2348_v63, 0.0 }
 0x2f5   :  { %2508 = vadd.xlane.f32.xlu0 %v2507_v62  ;;  %2505 = vadd.xlane.f32.xlu1 %v2504_v7  ;;  %v1672_v54 = vpop.f32.mrb[56].mxu1 }
 0x2f6   :  { %v3617_v11 = vpop.f32.mrb[57].mxu1  ;;  %v2356_v56 = vmul.f32 %v2300_v19, %v1672_v54 }
 0x2f7   :  { %v5387_v37 = vpop.permute.xlu1 %2618  ;;  %v5389_v28 = vpop.permute.xlu0 %2614 }
 0x2f8   :  { %v2510_v45 = vsel %vm41_vm0, %v2356_v56, 0.0 }
 0x2f9   :  { %2478 = vadd.xlane.f32.xlu0 %v2477_v32  ;;  %2475 = vadd.xlane.f32.xlu1 %v2474_v18  ;;  %v1677_v60 = vpop.f32.mrb[58].mxu1 }
 0x2fa   :  { %v3620_v20 = vpop.f32.mrb[59].mxu1  ;;  %v2357_v15 = vmul.f32 %v2301_v47, %v1677_v60 }
 0x2fc   :  { %v2513_v44 = vsel %vm41_vm0, %v2357_v15, 0.0 }
 0x2fd   :  { %2484 = vadd.xlane.f32.xlu0 %v2483_v53  ;;  %2481 = vadd.xlane.f32.xlu1 %v2480_v40  ;;  %v1682_v51 = vpop.f32.mrb[60].mxu1 }
 0x2fe   :  { %v3623_v42 = vpop.f32.mrb[61].mxu1  ;;  %v2358_v8 = vmul.f32 %v2302_v50, %v1682_v51 }
 0x300   :  { %v2516_v39 = vsel %vm41_vm0, %v2358_v8, 0.0 }
 0x301   :  { %2487 = vadd.xlane.f32.xlu1 %v2486_v10  ;;  %2514 = vadd.xlane.f32.xlu0 %v2513_v44  ;;  %v1687_v49 = vpop.f32.mrb[62].mxu1 }
 0x302   :  { %v2359_v9 = vmul.f32 %v2303_v0, %v1687_v49  ;;  %v3626_v12 = vpop.f32.mrb[63].mxu1 }
 0x304   :  { %v2519_v43 = vsel %vm41_vm0, %v2359_v9, 0.0 }
 0x305   :  { %2511 = vadd.xlane.f32.xlu1 %v2510_v45  ;;  %2520 = vadd.xlane.f32.xlu0 %v2519_v43  ;;  %v1692_v29 = vpop.f32.mrb[64].mxu1 }
 0x306   :  { %v3629_v36 = vpop.f32.mrb[65].mxu1  ;;  %v2360_v52 = vmul.f32 %v2304_v1, %v1692_v29 }
 0x308   :  { %v2522_v4 = vsel %vm41_vm0, %v2360_v52, 0.0 }
 0x309   :  { %2517 = vadd.xlane.f32.xlu1 %v2516_v39  ;;  %v1697_v48 = vpop.f32.mrb[66].mxu1 }
 0x30a   :  { %v2361_v55 = vmul.f32 %v2305_v3, %v1697_v48  ;;  %v3632_v14 = vpop.f32.mrb[67].mxu1 }
 0x30c   :  { %v2525_v31 = vsel %vm41_vm0, %v2361_v55, 0.0  ;;  %vm3201_vm0 = vcmask 1045509  }
 0x30d   :  { %2523 = vadd.xlane.f32.xlu1 %v2522_v4  ;;  %2526 = vadd.xlane.f32.xlu0 %v2525_v31  ;;  %v1702_v5 = vpop.f32.mrb[68].mxu1 }
 0x30e   :  { %v2362_v16 = vmul.f32 %v2306_v46, %v1702_v5  ;;  %v3635_v21 = vpop.f32.mrb[69].mxu1 }
 0x310   :  { %v2528_v6 = vsel %vm1773_vm5, %v2362_v16, 0.0 }
 0x311   :  { %2529 = vadd.xlane.f32.xlu1 %v2528_v6 }
 0x316   :  { %v2365_v35 = vpop.xlane.xlu0 %2364 }
 0x317   :  { %v2531_v41 = vmul.f32 0.03125, %v2365_v35 }
 0x319   :  { %v2627_v17 = vadd.f32 %v5377_v22, %v2531_v41 }
 0x31a   :  { %v2368_v23 = vpop.xlane.xlu1 %2367 }
 0x31b   :  { %v2532_v13 = vmul.f32 0.03125, %v2368_v23 }
 0x31d   :  { %v2628_v34 = vadd.f32 %v5368_v27, %v2532_v13 }
 0x31e   :  { %v2371_v25 = vpop.xlane.xlu1 %2370 }
 0x31f   :  { %v2533_v24 = vmul.f32 0.03125, %v2371_v25 }
 0x321   :  { %v2629_v62 = vadd.f32 %v5375_v26, %v2533_v24 }
 0x322   :  { %2743 = vperm.xlu1 %3684, %v2628_v34   ;;  %v2374_v58 = vpop.xlane.xlu1 %2373 }
 0x323   :  { %v2534_v30 = vmul.f32 0.03125, %v2374_v58  ;;  %2740 = vperm.xlu0 %3683, %v2627_v17  }
 0x325   :  { %v2630_v7 = vadd.f32 %v5384_v57, %v2534_v30 }
 0x326   :  { %2746 = vperm.xlu1 %3684, %v2629_v62  }
 0x327   :  { %2749 = vperm.xlu0 %3683, %v2630_v7  }
 0x332   :  { %v2407_v38 = vpop.xlane.xlu0 %2406 }
 0x333   :  { %v2545_v54 = vmul.f32 0.03125, %v2407_v38 }
 0x335   :  { %v2641_v11 = vadd.f32 %v5377_v22, %v2545_v54 }
 0x336   :  { %v2377_v59 = vpop.xlane.xlu0 %2376  ;;  %v2410_v47 = vpop.xlane.xlu1 %2409 }
 0x337   :  { %v2535_v2 = vmul.f32 0.03125, %v2377_v59  ;;  %v2546_v33 = vmul.f32 0.03125, %v2410_v47  ;;  %2782 = vperm.xlu1 %3684, %v2641_v11  }
 0x339   :  { %v2631_v32 = vadd.f32 %v5382_v61, %v2535_v2  ;;  %v2642_v18 = vadd.f32 %v5368_v27, %v2546_v33 }
 0x33a   :  { %v2413_v60 = vpop.xlane.xlu0 %2412  ;;  %v2380_v20 = vpop.xlane.xlu1 %2379 }
 0x33b   :  { %v2547_v19 = vmul.f32 0.03125, %v2413_v60  ;;  %v2536_v63 = vmul.f32 0.03125, %v2380_v20  ;;  %2752 = vperm.xlu1 %3684, %v2631_v32   ;;  %2785 = vperm.xlu0 %3683, %v2642_v18  }
 0x33d   :  { %v2643_v15 = vadd.f32 %v5375_v26, %v2547_v19  ;;  %v2632_v53 = vadd.f32 %v5389_v28, %v2536_v63 }
 0x33e   :  { %v2383_v40 = vpop.xlane.xlu0 %2382  ;;  %v2416_v51 = vpop.xlane.xlu1 %2415 }
 0x33f   :  { %v2537_v42 = vmul.f32 0.03125, %v2383_v40  ;;  %v2548_v0 = vmul.f32 0.03125, %v2416_v51  ;;  %2788 = vperm.xlu1 %3684, %v2643_v15   ;;  %2755 = vperm.xlu0 %3683, %v2632_v53  }
 0x341   :  { %v2633_v56 = vadd.f32 %v5387_v37, %v2537_v42  ;;  %v2644_v50 = vadd.f32 %v5384_v57, %v2548_v0 }
 0x342   :  { %v2419_v10 = vpop.xlane.xlu0 %2418  ;;  %v2386_v44 = vpop.xlane.xlu1 %2385 }
 0x343   :  { %v2549_v49 = vmul.f32 0.03125, %v2419_v10  ;;  %v2538_v9 = vmul.f32 0.03125, %v2386_v44  ;;  %2758 = vperm.xlu1 %3684, %v2633_v56   ;;  %2791 = vperm.xlu0 %3683, %v2644_v50  }
 0x345   :  { %v2645_v12 = vadd.f32 %v5382_v61, %v2549_v49  ;;  %v2634_v8 = vadd.f32 %v5377_v22, %v2538_v9 }
 0x346   :  { %v2389_v45 = vpop.xlane.xlu0 %2388  ;;  %v2422_v43 = vpop.xlane.xlu1 %2421 }
 0x347   :  { %v2539_v1 = vmul.f32 0.03125, %v2389_v45  ;;  %v2550_v29 = vmul.f32 0.03125, %v2422_v43  ;;  %2794 = vperm.xlu1 %3684, %v2645_v12   ;;  %2761 = vperm.xlu0 %3683, %v2634_v8  }
 0x349   :  { %v2635_v36 = vadd.f32 %v5368_v27, %v2539_v1  ;;  %v2646_v3 = vadd.f32 %v5389_v28, %v2550_v29 }
 0x34a   :  { %v2425_v52 = vpop.xlane.xlu0 %2424  ;;  %v2392_v39 = vpop.xlane.xlu1 %2391 }
 0x34b   :  { %v2551_v48 = vmul.f32 0.03125, %v2425_v52  ;;  %v2540_v55 = vmul.f32 0.03125, %v2392_v39  ;;  %2764 = vperm.xlu1 %3684, %v2635_v36   ;;  %2797 = vperm.xlu0 %3683, %v2646_v3  }
 0x34d   :  { %v2647_v14 = vadd.f32 %v5387_v37, %v2551_v48  ;;  %v2636_v46 = vadd.f32 %v5375_v26, %v2540_v55 }
 0x34e   :  { %v2449_v4 = vpop.xlane.xlu0 %2448 }
 0x34f   :  { %v2559_v31 = vmul.f32 0.03125, %v2449_v4  ;;  %2800 = vperm.xlu1 %3684, %v2647_v14   ;;  %2767 = vperm.xlu0 %3683, %v2636_v46  }
 0x351   :  { %v2655_v5 = vadd.f32 %v5377_v22, %v2559_v31 }
 0x352   :  { %v2395_v16 = vpop.xlane.xlu0 %2394  ;;  %v2452_v21 = vpop.xlane.xlu1 %2451 }
 0x353   :  { %v2541_v6 = vmul.f32 0.03125, %v2395_v16  ;;  %v2560_v35 = vmul.f32 0.03125, %v2452_v21  ;;  %2824 = vperm.xlu1 %3684, %v2655_v5  }
 0x355   :  { %v2637_v23 = vadd.f32 %v5384_v57, %v2541_v6  ;;  %v2656_v13 = vadd.f32 %v5368_v27, %v2560_v35 }
 0x356   :  { %v2455_v41 = vpop.xlane.xlu0 %2454  ;;  %v2398_v25 = vpop.xlane.xlu1 %2397 }
 0x357   :  { %v2561_v34 = vmul.f32 0.03125, %v2455_v41  ;;  %v2542_v24 = vmul.f32 0.03125, %v2398_v25  ;;  %2770 = vperm.xlu1 %3684, %v2637_v23   ;;  %2827 = vperm.xlu0 %3683, %v2656_v13  }
 0x359   :  { %v2657_v17 = vadd.f32 %v5375_v26, %v2561_v34  ;;  %v2638_v58 = vadd.f32 %v5382_v61, %v2542_v24 }
 0x35a   :  { %v2401_v30 = vpop.xlane.xlu0 %2400  ;;  %v2458_v62 = vpop.xlane.xlu1 %2457 }
 0x35b   :  { %v2543_v7 = vmul.f32 0.03125, %v2401_v30  ;;  %v2562_v38 = vmul.f32 0.03125, %v2458_v62  ;;  %2830 = vperm.xlu1 %3684, %v2657_v17   ;;  %2773 = vperm.xlu0 %3683, %v2638_v58  }
 0x35d   :  { %v2639_v54 = vadd.f32 %v5389_v28, %v2543_v7  ;;  %v2658_v11 = vadd.f32 %v5384_v57, %v2562_v38 }
 0x35e   :  { %v2461_v59 = vpop.xlane.xlu0 %2460  ;;  %v2404_v47 = vpop.xlane.xlu1 %2403 }
 0x35f   :  { %v2563_v2 = vmul.f32 0.03125, %v2461_v59  ;;  %v2544_v33 = vmul.f32 0.03125, %v2404_v47  ;;  %2776 = vperm.xlu1 %3684, %v2639_v54   ;;  %2833 = vperm.xlu0 %3683, %v2658_v11  }
 0x361   :  { %v2659_v32 = vadd.f32 %v5382_v61, %v2563_v2  ;;  %v2640_v18 = vadd.f32 %v5387_v37, %v2544_v33 }
 0x362   :  { %v2431_v60 = vpop.xlane.xlu0 %2430  ;;  %v2428_v20 = vpop.xlane.xlu1 %2427 }
 0x363   :  { %v2553_v19 = vmul.f32 0.03125, %v2431_v60  ;;  %v2552_v63 = vmul.f32 0.03125, %v2428_v20  ;;  %2836 = vperm.xlu1 %3684, %v2659_v32   ;;  %2779 = vperm.xlu0 %3683, %v2640_v18  }
 0x365   :  { %v2649_v15 = vadd.f32 %v5368_v27, %v2553_v19  ;;  %v2648_v53 = vadd.f32 %v5377_v22, %v2552_v63 }
 0x366   :  { %v2467_v40 = vpop.xlane.xlu0 %2466  ;;  %v2464_v51 = vpop.xlane.xlu1 %2463 }
 0x367   :  { %v2565_v42 = vmul.f32 0.03125, %v2467_v40  ;;  %v2564_v0 = vmul.f32 0.03125, %v2464_v51  ;;  %2806 = vperm.xlu1 %3684, %v2649_v15   ;;  %2803 = vperm.xlu0 %3683, %v2648_v53  }
 0x369   :  { %v2661_v56 = vadd.f32 %v5387_v37, %v2565_v42  ;;  %v2660_v50 = vadd.f32 %v5389_v28, %v2564_v0 }
 0x36a   :  { %v2491_v10 = vpop.xlane.xlu0 %2490  ;;  %v2434_v44 = vpop.xlane.xlu1 %2433 }
 0x36b   :  { %v2573_v49 = vmul.f32 0.03125, %v2491_v10  ;;  %v2554_v9 = vmul.f32 0.03125, %v2434_v44  ;;  %2842 = vperm.xlu1 %3684, %v2661_v56   ;;  %2839 = vperm.xlu0 %3683, %v2660_v50  }
 0x36d   :  { %v2669_v12 = vadd.f32 %v5377_v22, %v2573_v49  ;;  %v2650_v8 = vadd.f32 %v5375_v26, %v2554_v9  ;;  %v2907_v49 = vlaneseq }
 0x36e   :  { %v2437_v45 = vpop.xlane.xlu0 %2436  ;;  %v2494_v43 = vpop.xlane.xlu1 %2493 }
 0x36f   :  { %v2555_v1 = vmul.f32 0.03125, %v2437_v45  ;;  %v2574_v29 = vmul.f32 0.03125, %v2494_v43  ;;  %2866 = vperm.xlu1 %3684, %v2669_v12   ;;  %2809 = vperm.xlu0 %3683, %v2650_v8  }
 0x371   :  { %v2651_v36 = vadd.f32 %v5384_v57, %v2555_v1  ;;  %v2670_v3 = vadd.f32 %v5368_v27, %v2574_v29  ;;  %v2908_v29 = vand.u32 127, %v2907_v49 }
 0x372   :  { %v2497_v52 = vpop.xlane.xlu0 %2496  ;;  %v2440_v39 = vpop.xlane.xlu1 %2439 }
 0x373   :  { %v2556_v48 = vmul.f32 0.03125, %v2440_v39  ;;  %2812 = vperm.xlu1 %3684, %v2651_v36   ;;  %2869 = vperm.xlu0 %3683, %v2670_v3   ;;  %v2575_v55 = vmul.f32 0.03125, %v2497_v52 }
 0x375   :  { %v2652_v14 = vadd.f32 %v5382_v61, %v2556_v48  ;;  %v2671_v5 = vadd.f32 %v5375_v26, %v2575_v55 }
 0x376   :  { %v2443_v46 = vpop.xlane.xlu0 %2442  ;;  %v2500_v4 = vpop.xlane.xlu1 %2499 }
 0x377   :  { %v2557_v31 = vmul.f32 0.03125, %v2443_v46  ;;  %2815 = vperm.xlu0 %3683, %v2652_v14   ;;  %v2576_v21 = vmul.f32 0.03125, %v2500_v4  ;;  %v2910_v14 = vshrl.u32 %v2907_v49, 7  ;;  %v2913_v46 = vadd.s32 4294967288, %v2908_v29 }
 0x379   :  { %v2653_v16 = vadd.f32 %v5389_v28, %v2557_v31  ;;  %v2672_v13 = vadd.f32 %v5384_v57, %v2576_v21 }
 0x37a   :  { %v2503_v6 = vpop.xlane.xlu0 %2502  ;;  %v2446_v35 = vpop.xlane.xlu1 %2445 }
 0x37b   :  { %v2577_v23 = vmul.f32 0.03125, %v2503_v6  ;;  %2818 = vperm.xlu1 %3684, %v2653_v16   ;;  %2872 = vperm.xlu0 %3683, %v2671_v5   ;;  %v2558_v25 = vmul.f32 0.03125, %v2446_v35  ;;  %v2927_v16 = vadd.s32 4294967272, %v2908_v29  ;;  %v2920_v6 = vadd.s32 4294967280, %v2908_v29 }
 0x37d   :  { %v2673_v41 = vadd.f32 %v5382_v61, %v2577_v23  ;;  %v2654_v58 = vadd.f32 %v5387_v37, %v2558_v25 }
 0x37e   :  { %v2473_v34 = vpop.xlane.xlu0 %2472  ;;  %v2470_v24 = vpop.xlane.xlu1 %2469 }
 0x37f   :  { %v2567_v17 = vmul.f32 0.03125, %v2473_v34  ;;  %2878 = vperm.xlu1 %3684, %v2673_v41   ;;  %2875 = vperm.xlu0 %3683, %v2672_v13   ;;  %v2566_v62 = vmul.f32 0.03125, %v2470_v24  ;;  %v5451_v41 = vsub.s32 %v2927_v16, %v2910_v14  ;;  %v5455_v34 = vsub.s32 %v2920_v6, %v2910_v14 }
 0x381   :  { %v2663_v30 = vadd.f32 %v5368_v27, %v2567_v17  ;;  %v2662_v54 = vadd.f32 %v5377_v22, %v2566_v62 }
 0x382   :  { %v2509_v7 = vpop.xlane.xlu0 %2508  ;;  %v2506_v38 = vpop.xlane.xlu1 %2505 }
 0x383   :  { %2848 = vperm.xlu1 %3684, %v2663_v30   ;;  %2821 = vperm.xlu0 %3683, %v2654_v58   ;;  %v2578_v11 = vmul.f32 0.03125, %v2506_v38  ;;  %v2579_v33 = vmul.f32 0.03125, %v2509_v7  ;;  %v2934_v7 = vadd.s32 4294967264, %v2908_v29 }
 0x385   :  { %v2674_v32 = vadd.f32 %v5389_v28, %v2578_v11  ;;  %v2675_v63 = vadd.f32 %v5387_v37, %v2579_v33  ;;  %v5462_v11 = vsub.s32 %v2934_v7, %v2910_v14 }
 0x386   :  { %v2479_v59 = vpop.xlane.xlu0 %2478  ;;  %v2476_v47 = vpop.xlane.xlu1 %2475 }
 0x387   :  { %v2569_v2 = vmul.f32 0.03125, %v2479_v59  ;;  %2845 = vperm.xlu0 %3683, %v2662_v54   ;;  %v2568_v15 = vmul.f32 0.03125, %v2476_v47  ;;  %v2941_v54 = vadd.s32 4294967256, %v2908_v29 }
 0x389   :  { %v2665_v18 = vadd.f32 %v5384_v57, %v2569_v2  ;;  %v2664_v0 = vadd.f32 %v5375_v26, %v2568_v15  ;;  %v5464_v2 = vsub.s32 %v2941_v54, %v2910_v14 }
 0x38a   :  { %v2485_v60 = vpop.xlane.xlu0 %2484  ;;  %v2482_v20 = vpop.xlane.xlu1 %2481 }
 0x38b   :  { %v2570_v19 = vmul.f32 0.03125, %v2482_v20  ;;  %2854 = vperm.xlu1 %3684, %v2665_v18   ;;  %2881 = vperm.xlu0 %3683, %v2674_v32   ;;  %v2571_v56 = vmul.f32 0.03125, %v2485_v60  ;;  %v2948_v60 = vadd.s32 4294967248, %v2908_v29 }
 0x38d   :  { %v2666_v53 = vadd.f32 %v5382_v61, %v2570_v19  ;;  %v2667_v9 = vadd.f32 %v5389_v28, %v2571_v56 }
 0x38e   :  { %v2488_v40 = vpop.xlane.xlu1 %2487  ;;  %v2515_v42 = vpop.xlane.xlu0 %2514 }
 0x38f   :  { %v2572_v51 = vmul.f32 0.03125, %v2488_v40  ;;  %2884 = vperm.xlu0 %3683, %v2675_v63   ;;  %2857 = vperm.xlu1 %3684, %v2666_v53   ;;  %v2581_v12 = vmul.f32 0.03125, %v2515_v42 }
 0x391   :  { %v2668_v50 = vadd.f32 %v5387_v37, %v2572_v51  ;;  %v2677_v36 = vadd.f32 %v5368_v27, %v2581_v12  ;;  %v5445_v27 = vsub.s32 %v2908_v29, %v2910_v14  ;;  %v5473_v51 = vsub.s32 %v2948_v60, %v2910_v14 }
 0x392   :  { %v2512_v10 = vpop.xlane.xlu1 %2511  ;;  %v2521_v45 = vpop.xlane.xlu0 %2520 }
 0x393   :  { %v2580_v44 = vmul.f32 0.03125, %v2512_v10  ;;  %2851 = vperm.xlu0 %3683, %v2664_v0   ;;  %2863 = vperm.xlu1 %3684, %v2668_v50   ;;  %v2583_v3 = vmul.f32 0.03125, %v2521_v45 }
 0x395   :  { %v2676_v8 = vadd.f32 %v5377_v22, %v2580_v44  ;;  %v2679_v22 = vadd.f32 %v5384_v57, %v2583_v3 }
 0x396   :  { %v2518_v43 = vpop.xlane.xlu1 %2517 }
 0x397   :  { %v2582_v1 = vmul.f32 0.03125, %v2518_v43  ;;  %2860 = vperm.xlu0 %3683, %v2667_v9   ;;  %2887 = vperm.xlu1 %3684, %v2676_v8  }
 0x399   :  { %v2678_v52 = vadd.f32 %v5375_v26, %v2582_v1  ;;  %v5447_v26 = vsub.s32 %v2913_v46, %v2910_v14 }
 0x39a   :  { %v2527_v39 = vpop.xlane.xlu0 %2526  ;;  %v2524_v48 = vpop.xlane.xlu1 %2523 }
 0x39b   :  { %v2584_v55 = vmul.f32 0.03125, %v2524_v48  ;;  %2890 = vperm.xlu0 %3683, %v2677_v36   ;;  %2893 = vperm.xlu1 %3684, %v2678_v52   ;;  %v2585_v4 = vmul.f32 0.03125, %v2527_v39 }
 0x39d   :  { %v2680_v31 = vadd.f32 %v5382_v61, %v2584_v55  ;;  %v2681_v35 = vadd.f32 %v5389_v28, %v2585_v4 }
 0x39e   :  { %v2530_v5 = vpop.xlane.xlu1 %2529 }
 0x39f   :  { %v2586_v21 = vmul.f32 0.03125, %v2530_v5  ;;  %2896 = vperm.xlu0 %3683, %v2679_v22   ;;  %2899 = vperm.xlu1 %3684, %v2680_v31  }
 0x3a1   :  { %v2682_v23 = vadd.f32 %v5387_v37, %v2586_v21 }
 0x3a2   :  { %v2741_v13 = vpop.permute.xlu0 %2740  ;;  %v2744_v57 = vpop.permute.xlu1 %2743 }
 0x3a3   :  { %v2912_v61 = vrot.slane %v2741_v13, %v5445_v27  ;;  %v2917_v25 = vrot.slane %v2744_v57, %v5447_v26  ;;  %2902 = vperm.xlu1 %3684, %v2681_v35   ;;  %2905 = vperm.xlu0 %3683, %v2682_v23  }
 0x3a5   :  { %v2919_v24 = vsel %vm2918_vm6, %v2917_v25, %v2912_v61 }
 0x3a6   :  { %v2750_v17 = vpop.permute.xlu0 %2749  ;;  %v2747_v28 = vpop.permute.xlu1 %2746 }
 0x3a7   :  { %v2931_v37 = vrot.slane %v2750_v17, %v5451_v41  ;;  %v2924_v58 = vrot.slane %v2747_v28, %v5455_v34 }
 0x3a9   :  { %v2926_v30 = vsel %vm2925_vm7, %v2924_v58, %v2919_v24 }
 0x3aa   :  { %v2933_v62 = vsel %vm2932_vm8, %v2931_v37, %v2926_v30 }
 0x3b6   :  { %v2783_v38 = vpop.permute.xlu1 %2782 }
 0x3b7   :  { %v2992_v33 = vrot.slane %v2783_v38, %v5445_v27 }
 0x3ba   :  { %v2786_v59 = vpop.permute.xlu0 %2785  ;;  %v2753_v47 = vpop.permute.xlu1 %2752 }
 0x3bb   :  { %v2996_v32 = vrot.slane %v2786_v59, %v5447_v26  ;;  %v2938_v18 = vrot.slane %v2753_v47, %v5462_v11 }
 0x3bd   :  { %v2997_v20 = vsel %vm2918_vm6, %v2996_v32, %v2992_v33  ;;  %v2940_v19 = vsel %vm2939_vm9, %v2938_v18, %v2933_v62 }
 0x3be   :  { %v2756_v63 = vpop.permute.xlu0 %2755  ;;  %v2789_v15 = vpop.permute.xlu1 %2788 }
 0x3bf   :  { %v2945_v53 = vrot.slane %v2756_v63, %v5464_v2  ;;  %v3001_v40 = vrot.slane %v2789_v15, %v5455_v34 }
 0x3c1   :  { %v2947_v42 = vsel %vm2946_vm10, %v2945_v53, %v2940_v19  ;;  %v3002_v0 = vsel %vm2925_vm7, %v3001_v40, %v2997_v20 }
 0x3c2   :  { %v2792_v56 = vpop.permute.xlu0 %2791  ;;  %v2759_v50 = vpop.permute.xlu1 %2758 }
 0x3c3   :  { %v3006_v10 = vrot.slane %v2792_v56, %v5451_v41  ;;  %v2952_v44 = vrot.slane %v2759_v50, %v5473_v51 }
 0x3c5   :  { %v3007_v49 = vsel %vm2932_vm8, %v3006_v10, %v3002_v0  ;;  %v2954_v9 = vsel %vm2953_vm11, %v2952_v44, %v2947_v42 }
 0x3c6   :  { %v2762_v12 = vpop.permute.xlu0 %2761  ;;  %v2795_v8 = vpop.permute.xlu1 %2794 }
 0x3c7   :  { %v3011_v45 = vrot.slane %v2795_v8, %v5462_v11  ;;  %v2958_v36 = vrot.slane %v2762_v12, %v5445_v27 }
 0x3c9   :  { %v3012_v43 = vsel %vm2939_vm9, %v3011_v45, %v3007_v49 }
 0x3ca   :  { %v2798_v1 = vpop.permute.xlu0 %2797  ;;  %v2765_v29 = vpop.permute.xlu1 %2764 }
 0x3cb   :  { %v3016_v3 = vrot.slane %v2798_v1, %v5464_v2  ;;  %v2962_v52 = vrot.slane %v2765_v29, %v5447_v26 }
 0x3cd   :  { %v3017_v39 = vsel %vm2946_vm10, %v3016_v3, %v3012_v43  ;;  %v2963_v48 = vsel %vm2918_vm6, %v2962_v52, %v2958_v36 }
 0x3ce   :  { %v2768_v55 = vpop.permute.xlu0 %2767  ;;  %v2801_v14 = vpop.permute.xlu1 %2800 }
 0x3cf   :  { %v2967_v46 = vrot.slane %v2768_v55, %v5455_v34  ;;  %v3021_v22 = vrot.slane %v2801_v14, %v5473_v51 }
 0x3d1   :  { %v2968_v4 = vsel %vm2925_vm7, %v2967_v46, %v2963_v48  ;;  %v3022_v31 = vsel %vm2953_vm11, %v3021_v22, %v3017_v39 }
 0x3d2   :  { %v2825_v5 = vpop.permute.xlu1 %2824 }
 0x3d3   :  { %v3060_v6 = vrot.slane %v2825_v5, %v5445_v27 }
 0x3d6   :  { %v2828_v16 = vpop.permute.xlu0 %2827  ;;  %v2771_v21 = vpop.permute.xlu1 %2770 }
 0x3d7   :  { %v3064_v35 = vrot.slane %v2828_v16, %v5447_v26  ;;  %v2972_v23 = vrot.slane %v2771_v21, %v5451_v41 }
 0x3d9   :  { %v3065_v13 = vsel %vm2918_vm6, %v3064_v35, %v3060_v6  ;;  %v2973_v24 = vsel %vm2932_vm8, %v2972_v23, %v2968_v4 }
 0x3da   :  { %v2774_v57 = vpop.permute.xlu0 %2773  ;;  %v2831_v61 = vpop.permute.xlu1 %2830 }
 0x3db   :  { %v2977_v25 = vrot.slane %v2774_v57, %v5462_v11  ;;  %v3069_v0 = vrot.slane %v2831_v61, %v5455_v34 }
 0x3dd   :  { %v2978_v17 = vsel %vm2939_vm9, %v2977_v25, %v2973_v24  ;;  %v3070_v43 = vsel %vm2925_vm7, %v3069_v0, %v3065_v13 }
 0x3de   :  { %v2834_v28 = vpop.permute.xlu0 %2833  ;;  %v2777_v37 = vpop.permute.xlu1 %2776 }
 0x3df   :  { %v2982_v58 = vrot.slane %v2777_v37, %v5464_v2  ;;  %v3074_v10 = vrot.slane %v2834_v28, %v5451_v41 }
 0x3e1   :  { %v2983_v38 = vsel %vm2946_vm10, %v2982_v58, %v2978_v17  ;;  %v3075_v3 = vsel %vm2932_vm8, %v3074_v10, %v3070_v43 }
 0x3e2   :  { %v2780_v30 = vpop.permute.xlu0 %2779  ;;  %v2837_v62 = vpop.permute.xlu1 %2836 }
 0x3e3   :  { %v2987_v7 = vrot.slane %v2780_v30, %v5473_v51  ;;  %v3079_v49 = vrot.slane %v2837_v62, %v5462_v11 }
 0x3e5   :  { %v2988_v54 = vsel %vm2953_vm11, %v2987_v7, %v2983_v38  ;;  %v3080_v39 = vsel %vm2939_vm9, %v3079_v49, %v3075_v3 }
 0x3e6   :  { %v3194_v59 = vsel %vm3193_vm12, %v2988_v54, %v2954_v9  ;;  %v2804_v47 = vpop.permute.xlu0 %2803  ;;  %v2807_v33 = vpop.permute.xlu1 %2806 }
 0x3e7   :  { %v3196_v32 = vsel %vm3195_vm13, %v3022_v31, %v3194_v59  ;;  %v3026_v56 = vrot.slane %v2804_v47, %v5445_v27  ;;  %v3030_v50 = vrot.slane %v2807_v33, %v5447_v26 }
 0x3e9   :  { %v3031_v1 = vsel %vm2918_vm6, %v3030_v50, %v3026_v56 }
 0x3ea   :  { %v2840_v18 = vpop.permute.xlu0 %2839  ;;  %v2843_v60 = vpop.permute.xlu1 %2842 }
 0x3eb   :  { %v3084_v8 = vrot.slane %v2840_v18, %v5464_v2  ;;  %v3089_v48 = vrot.slane %v2843_v60, %v5473_v51 }
 0x3ed   :  { %v3085_v46 = vsel %vm2946_vm10, %v3084_v8, %v3080_v39 }
 0x3ee   :  { %v2810_v20 = vpop.permute.xlu0 %2809  ;;  %v5503_v19 = vpop.permute.xlu1 %2866  ;;  %v3090_v16 = vsel %vm2953_vm11, %v3089_v48, %v3085_v46 }
 0x3ef   :  { %v3035_v44 = vrot.slane %v2810_v20, %v5455_v34 }
 0x3f1   :  { %v3036_v52 = vsel %vm2925_vm7, %v3035_v44, %v3031_v1 }
 0x3f2   :  { %v5505_v63 = vpop.permute.xlu0 %2869  ;;  %v2813_v15 = vpop.permute.xlu1 %2812 }
 0x3f3   :  { %v3040_v9 = vrot.slane %v2813_v15, %v5451_v41  ;;  %v3132_v33 = vrot.slane %v5505_v63, %v5447_v26 }
 0x3f5   :  { %v3041_v55 = vsel %vm2932_vm8, %v3040_v9, %v3036_v52 }
 0x3f6   :  { %v2816_v53 = vpop.permute.xlu0 %2815 }
 0x3f7   :  { %v3045_v45 = vrot.slane %v2816_v53, %v5462_v11  ;;  %v3128_v53 = vrot.slane %v5503_v19, %v5445_v27 }
 0x3f9   :  { %v3046_v22 = vsel %vm2939_vm9, %v3045_v45, %v3041_v55  ;;  %v3133_v50 = vsel %vm2918_vm6, %v3132_v33, %v3128_v53 }
 0x3fa   :  { %v5507_v40 = vpop.permute.xlu0 %2872  ;;  %v2819_v42 = vpop.permute.xlu1 %2818 }
 0x3fb   :  { %v3050_v29 = vrot.slane %v2819_v42, %v5464_v2  ;;  %v3137_v18 = vrot.slane %v5507_v40, %v5455_v34 }
 0x3fd   :  { %v3051_v31 = vsel %vm2946_vm10, %v3050_v29, %v3046_v22  ;;  %v3138_v44 = vsel %vm2925_vm7, %v3137_v18, %v3133_v50 }
 0x3fe   :  { %v2876_v12 = vpop.permute.xlu0 %2875  ;;  %v5521_v36 = vpop.permute.xlu1 %2878 }
 0x3ff   :  { %v3142_v42 = vrot.slane %v2876_v12, %v5451_v41 }
 0x401   :  { %v3143_v12 = vsel %vm2932_vm8, %v3142_v42, %v3138_v44 }
 0x402   :  { %v2822_v14 = vpop.permute.xlu0 %2821  ;;  %v2849_v6 = vpop.permute.xlu1 %2848 }
 0x403   :  { %v3055_v4 = vrot.slane %v2822_v14, %v5473_v51  ;;  %v3098_v17 = vrot.slane %v2849_v6, %v5447_v26 }
 0x405   :  { %v3056_v5 = vsel %vm2953_vm11, %v3055_v4, %v3051_v31 }
 0x406   :  { %v3198_v21 = vsel %vm3197_vm14, %v3056_v5, %v3196_v32  ;;  %v2846_v35 = vpop.permute.xlu0 %2845 }
 0x407   :  { %v3200_v23 = vsel %vm3199_vm15, %v3090_v16, %v3198_v21  ;;  %v3094_v24 = vrot.slane %v2846_v35, %v5445_v27 }
 0x409   :  { %v3099_v30 = vsel %vm2918_vm6, %v3098_v17, %v3094_v24 }
 0x40a   :  { %v2882_v13 = vpop.permute.xlu0 %2881  ;;  %v2855_v57 = vpop.permute.xlu1 %2854 }
 0x40b   :  { %v3108_v62 = vrot.slane %v2855_v57, %v5451_v41 }
 0x40e   :  { %v2885_v61 = vpop.permute.xlu0 %2884  ;;  %v2858_v25 = vpop.permute.xlu1 %2857 }
 0x40f   :  { %v3113_v47 = vrot.slane %v2858_v25, %v5462_v11  ;;  %v3157_v1 = vrot.slane %v2885_v61, %v5473_v51 }
 0x412   :  { %v2852_v28 = vpop.permute.xlu0 %2851  ;;  %v2864_v37 = vpop.permute.xlu1 %2863 }
 0x413   :  { %v3103_v58 = vrot.slane %v2852_v28, %v5455_v34  ;;  %v3123_v49 = vrot.slane %v2864_v37, %v5473_v51 }
 0x415   :  { %v3104_v7 = vsel %vm2925_vm7, %v3103_v58, %v3099_v30 }
 0x416   :  { %v2861_v38 = vpop.permute.xlu0 %2860  ;;  %v2888_v54 = vpop.permute.xlu1 %2887  ;;  %v3109_v59 = vsel %vm2932_vm8, %v3108_v62, %v3104_v7 }
 0x417   :  { %v3118_v32 = vrot.slane %v2861_v38, %v5464_v2  ;;  %v3114_v60 = vsel %vm2939_vm9, %v3113_v47, %v3109_v59  ;;  %v3162_v0 = vrot.slane %v2888_v54, %v5445_v27  ;;  %v3147_v27 = vrot.slane %v5521_v36, %v5462_v11 }
 0x419   :  { %v3119_v10 = vsel %vm2946_vm10, %v3118_v32, %v3114_v60  ;;  %v3148_v36 = vsel %vm2939_vm9, %v3147_v27, %v3143_v12 }
 0x41a   :  { %v2891_v20 = vpop.permute.xlu0 %2890  ;;  %v2894_v15 = vpop.permute.xlu1 %2893  ;;  %v3124_v8 = vsel %vm2953_vm11, %v3123_v49, %v3119_v10 }
 0x41b   :  { %v3166_v56 = vrot.slane %v2891_v20, %v5447_v26  ;;  %v3171_v63 = vrot.slane %v2894_v15, %v5455_v34  ;;  %v3152_v34 = vrot.slane %v2882_v13, %v5464_v2  ;;  %v3202_v48 = vsel %vm3201_vm0, %v3124_v8, %v3200_v23 }
 0x41d   :  { %v3167_v40 = vsel %vm2918_vm6, %v3166_v56, %v3162_v0  ;;  %v3153_v55 = vsel %vm2946_vm10, %v3152_v34, %v3148_v36 }
 0x41e   :  { %v2897_v9 = vpop.permute.xlu0 %2896  ;;  %v2900_v19 = vpop.permute.xlu1 %2899  ;;  %v3172_v45 = vsel %vm2925_vm7, %v3171_v63, %v3167_v40  ;;  %v3158_v14 = vsel %vm2953_vm11, %v3157_v1, %v3153_v55 }
 0x41f   :  { %v3176_v26 = vrot.slane %v2897_v9, %v5451_v41  ;;  %v3181_v43 = vrot.slane %v2900_v19, %v5462_v11  ;;  %v3204_v4 = vsel %vm3203_vm1, %v3158_v14, %v3202_v48 }
 0x421   :  { %v3177_v29 = vsel %vm2932_vm8, %v3176_v26, %v3172_v45 }
 0x422   :  { %v2906_v3 = vpop.permute.xlu0 %2905  ;;  %v2903_v52 = vpop.permute.xlu1 %2902  ;;  %v3182_v11 = vsel %vm2939_vm9, %v3181_v43, %v3177_v29 }
 0x423   :  { %v3191_v41 = vrot.slane %v2906_v3, %v5473_v51  ;;  %v3186_v39 = vrot.slane %v2903_v52, %v5464_v2 }
 0x425   :  { %v3187_v46 = vsel %vm2946_vm10, %v3186_v39, %v3182_v11 }
 0x426   :  { %v3192_v22 = vsel %vm2953_vm11, %v3191_v41, %v3187_v46 }
 0x427   :  { %v3206_v31 = vsel %vm3205_vm3, %v3192_v22, %v3204_v4 }
 0x428   :  { %3208 = vst.msk [vmem:[#allocation2] sm:$0xff] %vm256_vm2, %v3206_v31 }
 0x429   :  { %3872 = shalt.err (!%p3869_p4)
}
 0x42a   :  { %s3873_s2 = scalar_lea.hbm %s5594_s4, 128 }
 0x42b   :  { %p3874_p5 = scmp.ne.s32.totalorder %s5594_s4, %s3873_s2  ;;  %p3877_p6 = scmp.lt.u32.totalorder %s3873_s2, %s5594_s4 }
 0x42d   :  { %p3879_p7 = pnand %p3877_p6, %p3874_p5 }
 0x42f   :  { %3882 = shalt.err (!%p3879_p7)
}
 0x430   :  { %3218 = dma.vmem_to_hbm [thread:$0]  %s3216_s7, 128, %s5594_s4, [#allocation3]  }
 0x431   :  { %3883 = dma.done.wait [#allocation3], 128  }
 0x432   :  { %3884 = vsyncadd [#allocation3], 4294967168 }
 0x433   :  { %3222 = vsyncpa [#allocation3], 1 }

</bundles_post_ra>
